<compile_context>
chip_gen: v5e
topology: v5e:2x2
jax: 0.10.0
libtpu: 0.0.40
codegen_flags: <defaults>
</compile_context>

<pallas_src>
import functools

import jax
import jax.numpy as jnp
from jax.experimental import pallas as pl
from jax.experimental.pallas import tpu as pltpu


def _layer_norm(x, g, b, eps=1e-5):
    # torch nn.LayerNorm semantics: biased variance over last dim, eps=1e-5 (f32 math).
    mu = jnp.mean(x, axis=-1, keepdims=True)
    var = jnp.mean((x - mu) ** 2, axis=-1, keepdims=True)
    return (x - mu) * jax.lax.rsqrt(var + eps) * g + b


def _encoder_kernel(Bt, S, D, H, Dh,
                    x0_ref, wqkv_ref, wo_ref, w1_ref, w2_ref, vec_ref, b1_ref,
                    lnf_ref, out_ref, x_scr):
    l = pl.program_id(1)
    n_layer = pl.num_programs(1)
    inner = H * Dh
    N = Bt * S
    bf16 = jnp.bfloat16

    # ---- init carry at the first layer step of each batch block ----
    @pl.when(l == 0)
    def _():
        x_scr[...] = x0_ref[...].reshape(N, D)

    x = x_scr[...]                                  # (N, D) f32 carry

    # unpack the packed per-layer vectors: [ln1_g, ln1_b, bo, ln2_g, ln2_b, b2]
    vec = vec_ref[0]                                # (6, D)
    ln1_g, ln1_b = vec[0:1], vec[1:2]
    bo = vec[2:3]
    ln2_g, ln2_b = vec[3:4], vec[4:5]
    b2 = vec[5:6]
    b1 = b1_ref[0]                                  # (1, 4D)

    # ---------------- self-attention block (pre-norm, residual) ----------------
    xn = _layer_norm(x, ln1_g, ln1_b)
    # attention scale already folded into the Q columns of wqkv (wrapper)
    qkv = jnp.dot(xn.astype(bf16), wqkv_ref[0],
                  preferred_element_type=jnp.float32)          # (N, 3*inner)

    # single fused relayout: heads -> batch axis for all of Q, K, V at once
    qkv_h = (qkv.reshape(Bt, S, 3 * H, Dh)
                .transpose(0, 2, 1, 3))                        # (Bt, 3H, S, Dh)
    q = qkv_h[:, 0:H].reshape(Bt * H, S, Dh)
    k = qkv_h[:, H:2 * H].reshape(Bt * H, S, Dh)
    v = qkv_h[:, 2 * H:3 * H].reshape(Bt * H, S, Dh)

    s = jnp.einsum('bqd,bkd->bqk', q.astype(bf16), k.astype(bf16),
                   preferred_element_type=jnp.float32)         # (Bt*H, S, S)
    s = s - jnp.max(s, axis=-1, keepdims=True)
    e = jnp.exp(s)
    # NOTE: approx reciprocal (EUP) adds ~1e-3-level relative error vs exact divide.
    p = e * pl.reciprocal(jnp.sum(e, axis=-1, keepdims=True), approx=True)
    ao = jnp.einsum('bqk,bkd->bqd', p.astype(bf16), v.astype(bf16),
                    preferred_element_type=jnp.float32)        # (Bt*H, S, Dh)
    ao = (ao.reshape(Bt, H, S, Dh)
            .transpose(0, 2, 1, 3)
            .reshape(N, inner))
    x = x + jnp.dot(ao.astype(bf16), wo_ref[0],
                    preferred_element_type=jnp.float32) + bo

    # ---------------- feed-forward block (pre-norm, residual) ------------------
    xn = _layer_norm(x, ln2_g, ln2_b)
    h1 = jnp.dot(xn.astype(bf16), w1_ref[0], preferred_element_type=jnp.float32) + b1
    # TODO(synk): torch nn.GELU() default is exact erf GELU; the tanh approximation
    #             (max abs diff ~1e-3) is used to avoid relying on erf lowering.
    h1 = jax.nn.gelu(h1, approximate=True)
    x = x + jnp.dot(h1.astype(bf16), w2_ref[0], preferred_element_type=jnp.float32) + b2

    # ---- write carry back; final LayerNorm + output write on last layer step ----
    x_scr[...] = x

    @pl.when(l == n_layer - 1)
    def _():
        lnf = lnf_ref[...]                          # (2, D): [gamma; beta]
        out_ref[...] = _layer_norm(x, lnf[0:1], lnf[1:2]).reshape(Bt, S, D)


def _pick_vmem_limit(default=32 << 20):
    # Generation-specific scoped-VMEM budget: ~96 MiB on 128-MiB parts (v5e/v6e),
    # ~48 MiB on v7x (64 MiB physical).  Falls back to 32 MiB if the query fails.
    try:
        phys = int(pltpu.get_tpu_info().vmem_capacity_bytes)
        return max(default, min(phys - (16 << 20), 96 << 20))
    except Exception:
        return default


def prepare_operands(tokens, params, *, n_head, dim_head):
    """Wrapper-side precompute shared by the Pallas path and the pure-JAX reference."""
    tok_emb = params["token_emb"]                    # (V, D)
    pos_emb = params["pos_emb"]                      # (max_seq_len, D)
    B, S = tokens.shape
    inner = n_head * dim_head

    # token-embedding gather + positional add done once in the wrapper
    x0 = (tok_emb[tokens] + pos_emb[:S][None, :, :]).astype(jnp.float32)   # (B, S, D)

    # fold attention scale into the Q columns of the fused QKV weight (one-time)
    scale = dim_head ** -0.5
    wqkv = params["wqkv"]
    wqkv = jnp.concatenate([wqkv[..., :inner] * scale, wqkv[..., inner:]], axis=-1)

    # pack small per-layer vectors: [ln1_g, ln1_b, bo, ln2_g, ln2_b, b2] -> (L, 6, D)
    vecs = jnp.concatenate(
        [params["ln1_g"], params["ln1_b"], params["bo"],
         params["ln2_g"], params["ln2_b"], params["b2"]], axis=1).astype(jnp.float32)
    lnf = jnp.concatenate([params["lnf_g"], params["lnf_b"]], axis=0).astype(jnp.float32)

    return {
        "x0": x0,
        "wqkv": wqkv.astype(jnp.bfloat16),
        "wo": params["wo"].astype(jnp.bfloat16),
        "w1": params["w1"].astype(jnp.bfloat16),
        "w2": params["w2"].astype(jnp.bfloat16),
        "vecs": vecs,
        "b1": params["b1"].astype(jnp.float32),      # (L, 1, 4D)
        "lnf": lnf,                                  # (2, D)
    }


def transformer_embedder(tokens, params, *, n_layer, n_head, dim_head,
                         block_batch=None, vmem_limit_bytes=None):
    ops = prepare_operands(tokens, params, n_head=n_head, dim_head=dim_head)
    x0 = ops["x0"]
    B, S, D = x0.shape

    # Bt = B (1 batch block) minimizes weight re-streaming (v5e/v6e); pass
    # block_batch = B // 2 on v7x so both TensorCores get a batch block.
    Bt = B if block_batch is None else block_batch
    assert B % Bt == 0, "block_batch must divide batch size"

    if vmem_limit_bytes is None:
        vmem_limit_bytes = _pick_vmem_limit()

    def per_layer(a):        # stream one layer per grid step along the last grid axis
        return pl.BlockSpec((1,) + a.shape[1:], lambda b, l: (l, 0, 0))

    in_specs = [
        pl.BlockSpec((Bt, S, D), lambda b, l: (b, 0, 0)),     # x0 (per batch block)
        per_layer(ops["wqkv"]), per_layer(ops["wo"]),
        per_layer(ops["w1"]), per_layer(ops["w2"]),
        per_layer(ops["vecs"]), per_layer(ops["b1"]),
        pl.BlockSpec((2, D), lambda b, l: (0, 0)),            # final-LN params
    ]
    out_specs = pl.BlockSpec((Bt, S, D), lambda b, l: (b, 0, 0))

    kernel = functools.partial(_encoder_kernel, Bt, S, D, n_head, dim_head)

    return pl.pallas_call(
        kernel,
        out_shape=jax.ShapeDtypeStruct((B, S, D), jnp.float32),
        grid=(B // Bt, n_layer),
        in_specs=in_specs,
        out_specs=out_specs,
        scratch_shapes=[pltpu.VMEM((Bt * S, D), jnp.float32)],   # activation carry
        compiler_params=pltpu.CompilerParams(
            # batch axis shards across TensorCores; layer axis carries x -> arbitrary
            dimension_semantics=("parallel", "arbitrary"),
            vmem_limit_bytes=vmem_limit_bytes,
        ),
    )(ops["x0"], ops["wqkv"], ops["wo"], ops["w1"], ops["w2"],
      ops["vecs"], ops["b1"], ops["lnf"])


def reference_forward(ops, *, n_head, dim_head):
    """Pure-JAX replica of the kernel math (same bf16 weights / f32 accumulation)."""
    x0 = ops["x0"]
    B, S, D = x0.shape
    H, Dh = n_head, dim_head
    inner = H * Dh
    bf16 = jnp.bfloat16
    n_layer = ops["wqkv"].shape[0]

    x = x0.reshape(B * S, D)
    for l in range(n_layer):
        vec = ops["vecs"][l]
        ln1_g, ln1_b, bo, ln2_g, ln2_b, b2 = (vec[i:i + 1] for i in range(6))
        b1 = ops["b1"][l]

        xn = _layer_norm(x, ln1_g, ln1_b)
        qkv = jnp.dot(xn.astype(bf16), ops["wqkv"][l], preferred_element_type=jnp.float32)
        q, k, v = qkv[:, :inner], qkv[:, inner:2 * inner], qkv[:, 2 * inner:]

        def heads(t):
            return t.reshape(B, S, H, Dh).transpose(0, 2, 1, 3).reshape(B * H, S, Dh)

        qh, kh, vh = heads(q), heads(k), heads(v)
        s = jnp.einsum('bqd,bkd->bqk', qh.astype(bf16), kh.astype(bf16),
                       preferred_element_type=jnp.float32)
        s = s - jnp.max(s, axis=-1, keepdims=True)
        e = jnp.exp(s)
        p = e / jnp.sum(e, axis=-1, keepdims=True)
        ao = jnp.einsum('bqk,bkd->bqd', p.astype(bf16), vh.astype(bf16),
                        preferred_element_type=jnp.float32)
        ao = ao.reshape(B, H, S, Dh).transpose(0, 2, 1, 3).reshape(B * S, inner)
        x = x + jnp.dot(ao.astype(bf16), ops["wo"][l], preferred_element_type=jnp.float32) + bo

        xn = _layer_norm(x, ln2_g, ln2_b)
        h1 = jnp.dot(xn.astype(bf16), ops["w1"][l], preferred_element_type=jnp.float32) + b1
        h1 = jax.nn.gelu(h1, approximate=True)
        x = x + jnp.dot(h1.astype(bf16), ops["w2"][l], preferred_element_type=jnp.float32) + b2

    lnf = ops["lnf"]
    return _layer_norm(x, lnf[0:1], lnf[1:2]).reshape(B, S, D)


def init_params(key, *, vocab_size, max_seq_len, dim, n_layer, n_head,
                dim_head, ff_mult=4):
    inner = n_head * dim_head
    ff = dim * ff_mult
    keys = iter(jax.random.split(key, 16))

    def nrm(shape, scale=0.02):
        return (scale * jax.random.normal(next(keys), shape)).astype(jnp.float32)

    return {
        "token_emb": nrm((vocab_size, dim)),
        "pos_emb":   nrm((max_seq_len, dim)),
        "ln1_g": jnp.ones((n_layer, 1, dim), jnp.float32),
        "ln1_b": jnp.zeros((n_layer, 1, dim), jnp.float32),
        "wqkv":  nrm((n_layer, dim, 3 * inner)),       # fused Q/K/V projection
        "wo":    nrm((n_layer, inner, dim)),
        "bo":    jnp.zeros((n_layer, 1, dim), jnp.float32),
        "ln2_g": jnp.ones((n_layer, 1, dim), jnp.float32),
        "ln2_b": jnp.zeros((n_layer, 1, dim), jnp.float32),
        "w1":    nrm((n_layer, dim, ff)),
        "b1":    jnp.zeros((n_layer, 1, ff), jnp.float32),
        "w2":    nrm((n_layer, ff, dim)),
        "b2":    jnp.zeros((n_layer, 1, dim), jnp.float32),
        "lnf_g": jnp.ones((1, dim), jnp.float32),
        "lnf_b": jnp.zeros((1, dim), jnp.float32),
    }


if __name__ == "__main__":
    # TransformerEmbedder(n_embed=32, n_layer=2, vocab_size=100, max_seq_len=16)
    B, S = 2, 8
    n_embed, n_layer, vocab_size, max_seq_len = 32, 2, 100, 16
    n_head, dim_head = 8, 64          # x-transformers Attention defaults

    key = jax.random.PRNGKey(0)
    k_params, k_tok = jax.random.split(key)
    params = init_params(k_params, vocab_size=vocab_size, max_seq_len=max_seq_len,
                         dim=n_embed, n_layer=n_layer, n_head=n_head,
                         dim_head=dim_head)
    tokens = jax.random.randint(k_tok, (B, S), 0, vocab_size, dtype=jnp.int32)

    # block_batch=1 exercises both the batch-block ("parallel") axis and the
    # per-block carry re-init; use block_batch=None (single batch block) in
    # production on v5e/v6e to avoid re-streaming the weight stack.
    z = transformer_embedder(tokens, params, n_layer=n_layer,
                             n_head=n_head, dim_head=dim_head, block_batch=1)
    jax.block_until_ready(z)
    assert z.shape == (B, S, n_embed) and z.dtype == jnp.float32
    assert bool(jnp.all(jnp.isfinite(z)))

    # sanity-check against a pure-JAX replica of the same math (loose tolerance
    # covers EUP approx-reciprocal + transcendental differences)
    ops = prepare_operands(tokens, params, n_head=n_head, dim_head=dim_head)
    z_ref = reference_forward(ops, n_head=n_head, dim_head=dim_head)
    max_diff = float(jnp.max(jnp.abs(z - z_ref)))
    assert max_diff < 5e-2, f"kernel vs reference max abs diff {max_diff}"

    print("KERNEL_OK")
</pallas_src>

<mosaic_0001>
module attributes {stable_mosaic.version = 11 : i64} {
  func.func @_encoder_kernel(%arg0: i32, %arg1: i32, %arg2: memref<1x8x32xf32, #tpu.memory_space<vmem>>, %arg3: memref<1x32x1536xbf16, #tpu.memory_space<vmem>>, %arg4: memref<1x512x32xbf16, #tpu.memory_space<vmem>>, %arg5: memref<1x32x128xbf16, #tpu.memory_space<vmem>>, %arg6: memref<1x128x32xbf16, #tpu.memory_space<vmem>>, %arg7: memref<1x6x32xf32, #tpu.memory_space<vmem>>, %arg8: memref<1x1x128xf32, #tpu.memory_space<vmem>>, %arg9: memref<2x32xf32, #tpu.memory_space<vmem>>, %arg10: memref<1x8x32xf32, #tpu.memory_space<vmem>>, %arg11: memref<8x32xf32, #tpu.memory_space<vmem>>) attributes {dimension_semantics = [#tpu.dimension_semantics<parallel>, #tpu.dimension_semantics<arbitrary>], iteration_bounds = array<i64: 2, 2>, scalar_prefetch = 0 : i64, scratch_operands = 1 : i64, tpu.core_type = #tpu.core_type<tc>, window_params = [{transform_indices = @transform_0, window_bounds = array<i64: 1, 8, 32>}, {transform_indices = @transform_1, window_bounds = array<i64: 1, 32, 1536>}, {transform_indices = @transform_2, window_bounds = array<i64: 1, 512, 32>}, {transform_indices = @transform_3, window_bounds = array<i64: 1, 32, 128>}, {transform_indices = @transform_4, window_bounds = array<i64: 1, 128, 32>}, {transform_indices = @transform_5, window_bounds = array<i64: 1, 6, 32>}, {transform_indices = @transform_6, window_bounds = array<i64: 1, 1, 128>}, {pipeline_mode = #tpu.pipeline_mode<synchronous>, transform_indices = @transform_7, window_bounds = array<i64: 2, 32>}, {transform_indices = @transform_8, window_bounds = array<i64: 1, 8, 32>}]} {
    %c0_i32 = arith.constant 0 : i32
    %0 = arith.cmpi eq, %arg1, %c0_i32 : i32
    %1 = arith.extui %0 : i1 to i32
    %c0_i32_0 = arith.constant 0 : i32
    %2 = arith.cmpi ne, %1, %c0_i32_0 : i32
    scf.if %2 {
      %c0_44 = arith.constant 0 : index
      %c0_45 = arith.constant 0 : index
      %c0_46 = arith.constant 0 : index
      %126 = vector.load %arg2[%c0_44, %c0_45, %c0_46] : memref<1x8x32xf32, #tpu.memory_space<vmem>>, vector<1x8x32xf32>
      %127 = vector.shape_cast %126 : vector<1x8x32xf32> to vector<8x32xf32>
      %c0_47 = arith.constant 0 : index
      %c0_48 = arith.constant 0 : index
      %128 = vector.load %arg11[%c0_47, %c0_48] : memref<8x32xf32, #tpu.memory_space<vmem>>, vector<8x32xf32>
      tpu.vector_store %arg11[%c0_47, %c0_48], %127 {strides = array<i32>} : memref<8x32xf32, #tpu.memory_space<vmem>>, vector<8x32xf32>,
    } else {
    }
    %c0 = arith.constant 0 : index
    %c0_1 = arith.constant 0 : index
    %3 = vector.load %arg11[%c0, %c0_1] : memref<8x32xf32, #tpu.memory_space<vmem>>, vector<8x32xf32>
    %c0_2 = arith.constant 0 : index
    %c0_3 = arith.constant 0 : index
    %c0_4 = arith.constant 0 : index
    %4 = vector.load %arg7[%c0_2, %c0_3, %c0_4] : memref<1x6x32xf32, #tpu.memory_space<vmem>>, vector<1x6x32xf32>
    %5 = vector.shape_cast %4 : vector<1x6x32xf32> to vector<6x32xf32>
    %6 = vector.extract_strided_slice %5 {offsets = [0, 0], sizes = [1, 32], strides = [1, 1]} : vector<6x32xf32> to vector<1x32xf32>
    %7 = vector.extract_strided_slice %5 {offsets = [1, 0], sizes = [1, 32], strides = [1, 1]} : vector<6x32xf32> to vector<1x32xf32>
    %8 = vector.extract_strided_slice %5 {offsets = [2, 0], sizes = [1, 32], strides = [1, 1]} : vector<6x32xf32> to vector<1x32xf32>
    %9 = vector.extract_strided_slice %5 {offsets = [3, 0], sizes = [1, 32], strides = [1, 1]} : vector<6x32xf32> to vector<1x32xf32>
    %10 = vector.extract_strided_slice %5 {offsets = [4, 0], sizes = [1, 32], strides = [1, 1]} : vector<6x32xf32> to vector<1x32xf32>
    %11 = vector.extract_strided_slice %5 {offsets = [5, 0], sizes = [1, 32], strides = [1, 1]} : vector<6x32xf32> to vector<1x32xf32>
    %c0_5 = arith.constant 0 : index
    %c0_6 = arith.constant 0 : index
    %c0_7 = arith.constant 0 : index
    %12 = vector.load %arg8[%c0_5, %c0_6, %c0_7] : memref<1x1x128xf32, #tpu.memory_space<vmem>>, vector<1x1x128xf32>
    %13 = vector.shape_cast %12 : vector<1x1x128xf32> to vector<1x128xf32>
    %cst = arith.constant dense<0.000000e+00> : vector<8xf32>
    %14 = vector.multi_reduction <add>, %3, %cst [1] : vector<8x32xf32> to vector<8xf32>
    %15 = vector.shape_cast %14 : vector<8xf32> to vector<8x1xf32>
    %cst_8 = arith.constant 3.200000e+01 : f32
    %16 = vector.broadcast %cst_8 : f32 to vector<8x1xf32>
    %17 = arith.divf %15, %16 : vector<8x1xf32>
    %18 = vector.broadcast %17 : vector<8x1xf32> to vector<8x32xf32>
    %19 = arith.subf %3, %18 : vector<8x32xf32>
    %20 = arith.mulf %19, %19 : vector<8x32xf32>
    %cst_9 = arith.constant dense<0.000000e+00> : vector<8xf32>
    %21 = vector.multi_reduction <add>, %20, %cst_9 [1] : vector<8x32xf32> to vector<8xf32>
    %22 = vector.shape_cast %21 : vector<8xf32> to vector<8x1xf32>
    %cst_10 = arith.constant 3.200000e+01 : f32
    %23 = vector.broadcast %cst_10 : f32 to vector<8x1xf32>
    %24 = arith.divf %22, %23 : vector<8x1xf32>
    %25 = vector.broadcast %17 : vector<8x1xf32> to vector<8x32xf32>
    %26 = arith.subf %3, %25 : vector<8x32xf32>
    %cst_11 = arith.constant 9.99999974E-6 : f32
    %27 = vector.broadcast %cst_11 : f32 to vector<8x1xf32>
    %28 = arith.addf %24, %27 : vector<8x1xf32>
    %29 = math.rsqrt %28 : vector<8x1xf32>
    %30 = vector.broadcast %29 : vector<8x1xf32> to vector<8x32xf32>
    %31 = arith.mulf %26, %30 : vector<8x32xf32>
    %32 = vector.broadcast %6 : vector<1x32xf32> to vector<8x32xf32>
    %33 = arith.mulf %31, %32 : vector<8x32xf32>
    %34 = vector.broadcast %7 : vector<1x32xf32> to vector<8x32xf32>
    %35 = arith.addf %33, %34 : vector<8x32xf32>
    %36 = arith.truncf %35 : vector<8x32xf32> to vector<8x32xbf16>
    %c0_12 = arith.constant 0 : index
    %c0_13 = arith.constant 0 : index
    %c0_14 = arith.constant 0 : index
    %37 = vector.load %arg3[%c0_12, %c0_13, %c0_14] : memref<1x32x1536xbf16, #tpu.memory_space<vmem>>, vector<1x32x1536xbf16>
    %38 = vector.shape_cast %37 : vector<1x32x1536xbf16> to vector<32x1536xbf16>
    %cst_15 = arith.constant dense<0.000000e+00> : vector<8x1536xf32>
    %39 = tpu.matmul %36, %38, %cst_15 {dimension_numbers = #tpu.dot_dimension_numbers<[1], [0], [0], [1], [0, 0, 1, 1], [], []>} : vector<8x32xbf16>, vector<32x1536xbf16>, vector<8x1536xf32> -> vector<8x1536xf32>
    %40 = vector.shape_cast %39 : vector<8x1536xf32> to vector<1x8x24x64xf32>
    %41 = tpu.transpose %40, [0, 2, 1, 3] : vector<1x8x24x64xf32> -> vector<1x24x8x64xf32>
    %42 = vector.extract_strided_slice %41 {offsets = [0, 0, 0, 0], sizes = [1, 8, 8, 64], strides = [1, 1, 1, 1]} : vector<1x24x8x64xf32> to vector<1x8x8x64xf32>
    %43 = vector.shape_cast %42 : vector<1x8x8x64xf32> to vector<8x8x64xf32>
    %44 = vector.extract_strided_slice %41 {offsets = [0, 8, 0, 0], sizes = [1, 8, 8, 64], strides = [1, 1, 1, 1]} : vector<1x24x8x64xf32> to vector<1x8x8x64xf32>
    %45 = vector.shape_cast %44 : vector<1x8x8x64xf32> to vector<8x8x64xf32>
    %46 = vector.extract_strided_slice %41 {offsets = [0, 16, 0, 0], sizes = [1, 8, 8, 64], strides = [1, 1, 1, 1]} : vector<1x24x8x64xf32> to vector<1x8x8x64xf32>
    %47 = vector.shape_cast %46 : vector<1x8x8x64xf32> to vector<8x8x64xf32>
    %48 = arith.truncf %43 : vector<8x8x64xf32> to vector<8x8x64xbf16>
    %49 = arith.truncf %45 : vector<8x8x64xf32> to vector<8x8x64xbf16>
    "tpu.trace_start"() <{level = 10 : i32, message = "bqd,bkd->bqk"}> : () -> ()
    %cst_16 = arith.constant dense<0.000000e+00> : vector<8x8x8xf32>
    %50 = tpu.matmul %48, %49, %cst_16 {dimension_numbers = #tpu.dot_dimension_numbers<[2], [2], [1], [1], [0, 0, 0, 1, 1, 1], [0], [0]>} : vector<8x8x64xbf16>, vector<8x8x64xbf16>, vector<8x8x8xf32> -> vector<8x8x8xf32>
    "tpu.trace_stop"() : () -> ()
    %cst_17 = arith.constant dense<0xFF800000> : vector<8x8xf32>
    %51 = vector.multi_reduction <maximumf>, %50, %cst_17 [2] : vector<8x8x8xf32> to vector<8x8xf32>
    %52 = vector.shape_cast %51 : vector<8x8xf32> to vector<8x8x1xf32>
    %53 = vector.broadcast %52 : vector<8x8x1xf32> to vector<8x8x8xf32>
    %54 = arith.subf %50, %53 : vector<8x8x8xf32>
    %55 = math.exp %54 : vector<8x8x8xf32>
    %cst_18 = arith.constant dense<0.000000e+00> : vector<8x8xf32>
    %56 = vector.multi_reduction <add>, %55, %cst_18 [2] : vector<8x8x8xf32> to vector<8x8xf32>
    %57 = vector.shape_cast %56 : vector<8x8xf32> to vector<8x8x1xf32>
    %58 = tpu.reciprocal %57 {approx = true} : vector<8x8x1xf32> -> vector<8x8x1xf32>
    %59 = vector.broadcast %58 : vector<8x8x1xf32> to vector<8x8x8xf32>
    %60 = arith.mulf %55, %59 : vector<8x8x8xf32>
    %61 = arith.truncf %60 : vector<8x8x8xf32> to vector<8x8x8xbf16>
    %62 = arith.truncf %47 : vector<8x8x64xf32> to vector<8x8x64xbf16>
    "tpu.trace_start"() <{level = 10 : i32, message = "bqk,bkd->bqd"}> : () -> ()
    %cst_19 = arith.constant dense<0.000000e+00> : vector<8x8x64xf32>
    %63 = tpu.matmul %61, %62, %cst_19 {dimension_numbers = #tpu.dot_dimension_numbers<[2], [1], [1], [2], [0, 0, 0, 1, 1, 2], [0], [0]>} : vector<8x8x8xbf16>, vector<8x8x64xbf16>, vector<8x8x64xf32> -> vector<8x8x64xf32>
    "tpu.trace_stop"() : () -> ()
    %64 = vector.shape_cast %63 : vector<8x8x64xf32> to vector<1x8x8x64xf32>
    %65 = tpu.transpose %64, [0, 2, 1, 3] : vector<1x8x8x64xf32> -> vector<1x8x8x64xf32>
    %66 = vector.shape_cast %65 : vector<1x8x8x64xf32> to vector<8x512xf32>
    %67 = arith.truncf %66 : vector<8x512xf32> to vector<8x512xbf16>
    %c0_20 = arith.constant 0 : index
    %c0_21 = arith.constant 0 : index
    %c0_22 = arith.constant 0 : index
    %68 = vector.load %arg4[%c0_20, %c0_21, %c0_22] : memref<1x512x32xbf16, #tpu.memory_space<vmem>>, vector<1x512x32xbf16>
    %69 = vector.shape_cast %68 : vector<1x512x32xbf16> to vector<512x32xbf16>
    %cst_23 = arith.constant dense<0.000000e+00> : vector<8x32xf32>
    %70 = tpu.matmul %67, %69, %cst_23 {dimension_numbers = #tpu.dot_dimension_numbers<[1], [0], [0], [1], [0, 0, 1, 1], [], []>} : vector<8x512xbf16>, vector<512x32xbf16>, vector<8x32xf32> -> vector<8x32xf32>
    %71 = arith.addf %3, %70 : vector<8x32xf32>
    %72 = vector.broadcast %8 : vector<1x32xf32> to vector<8x32xf32>
    %73 = arith.addf %71, %72 : vector<8x32xf32>
    %cst_24 = arith.constant dense<0.000000e+00> : vector<8xf32>
    %74 = vector.multi_reduction <add>, %73, %cst_24 [1] : vector<8x32xf32> to vector<8xf32>
    %75 = vector.shape_cast %74 : vector<8xf32> to vector<8x1xf32>
    %cst_25 = arith.constant 3.200000e+01 : f32
    %76 = vector.broadcast %cst_25 : f32 to vector<8x1xf32>
    %77 = arith.divf %75, %76 : vector<8x1xf32>
    %78 = vector.broadcast %77 : vector<8x1xf32> to vector<8x32xf32>
    %79 = arith.subf %73, %78 : vector<8x32xf32>
    %80 = arith.mulf %79, %79 : vector<8x32xf32>
    %cst_26 = arith.constant dense<0.000000e+00> : vector<8xf32>
    %81 = vector.multi_reduction <add>, %80, %cst_26 [1] : vector<8x32xf32> to vector<8xf32>
    %82 = vector.shape_cast %81 : vector<8xf32> to vector<8x1xf32>
    %cst_27 = arith.constant 3.200000e+01 : f32
    %83 = vector.broadcast %cst_27 : f32 to vector<8x1xf32>
    %84 = arith.divf %82, %83 : vector<8x1xf32>
    %85 = vector.broadcast %77 : vector<8x1xf32> to vector<8x32xf32>
    %86 = arith.subf %73, %85 : vector<8x32xf32>
    %cst_28 = arith.constant 9.99999974E-6 : f32
    %87 = vector.broadcast %cst_28 : f32 to vector<8x1xf32>
    %88 = arith.addf %84, %87 : vector<8x1xf32>
    %89 = math.rsqrt %88 : vector<8x1xf32>
    %90 = vector.broadcast %89 : vector<8x1xf32> to vector<8x32xf32>
    %91 = arith.mulf %86, %90 : vector<8x32xf32>
    %92 = vector.broadcast %9 : vector<1x32xf32> to vector<8x32xf32>
    %93 = arith.mulf %91, %92 : vector<8x32xf32>
    %94 = vector.broadcast %10 : vector<1x32xf32> to vector<8x32xf32>
    %95 = arith.addf %93, %94 : vector<8x32xf32>
    %96 = arith.truncf %95 : vector<8x32xf32> to vector<8x32xbf16>
    %c0_29 = arith.constant 0 : index
    %c0_30 = arith.constant 0 : index
    %c0_31 = arith.constant 0 : index
    %97 = vector.load %arg5[%c0_29, %c0_30, %c0_31] : memref<1x32x128xbf16, #tpu.memory_space<vmem>>, vector<1x32x128xbf16>
    %98 = vector.shape_cast %97 : vector<1x32x128xbf16> to vector<32x128xbf16>
    %cst_32 = arith.constant dense<0.000000e+00> : vector<8x128xf32>
    %99 = tpu.matmul %96, %98, %cst_32 {dimension_numbers = #tpu.dot_dimension_numbers<[1], [0], [0], [1], [0, 0, 1, 1], [], []>} : vector<8x32xbf16>, vector<32x128xbf16>, vector<8x128xf32> -> vector<8x128xf32>
    %100 = vector.broadcast %13 : vector<1x128xf32> to vector<8x128xf32>
    %101 = arith.addf %99, %100 : vector<8x128xf32>
    %102 = arith.mulf %101, %101 : vector<8x128xf32>
    %103 = arith.mulf %101, %102 : vector<8x128xf32>
    %cst_33 = arith.constant 4.471500e-02 : f32
    %104 = vector.broadcast %cst_33 : f32 to vector<8x128xf32>
    %105 = arith.mulf %104, %103 : vector<8x128xf32>
    %106 = arith.addf %101, %105 : vector<8x128xf32>
    %cst_34 = arith.constant 0.797884583 : f32
    %107 = vector.broadcast %cst_34 : f32 to vector<8x128xf32>
    %108 = arith.mulf %107, %106 : vector<8x128xf32>
    %109 = math.tanh %108 : vector<8x128xf32>
    %cst_35 = arith.constant 1.000000e+00 : f32
    %110 = vector.broadcast %cst_35 : f32 to vector<8x128xf32>
    %111 = arith.addf %110, %109 : vector<8x128xf32>
    %cst_36 = arith.constant 5.000000e-01 : f32
    %112 = vector.broadcast %cst_36 : f32 to vector<8x128xf32>
    %113 = arith.mulf %112, %111 : vector<8x128xf32>
    %114 = arith.mulf %101, %113 : vector<8x128xf32>
    %115 = arith.truncf %114 : vector<8x128xf32> to vector<8x128xbf16>
    %c0_37 = arith.constant 0 : index
    %c0_38 = arith.constant 0 : index
    %c0_39 = arith.constant 0 : index
    %116 = vector.load %arg6[%c0_37, %c0_38, %c0_39] : memref<1x128x32xbf16, #tpu.memory_space<vmem>>, vector<1x128x32xbf16>
    %117 = vector.shape_cast %116 : vector<1x128x32xbf16> to vector<128x32xbf16>
    %cst_40 = arith.constant dense<0.000000e+00> : vector<8x32xf32>
    %118 = tpu.matmul %115, %117, %cst_40 {dimension_numbers = #tpu.dot_dimension_numbers<[1], [0], [0], [1], [0, 0, 1, 1], [], []>} : vector<8x128xbf16>, vector<128x32xbf16>, vector<8x32xf32> -> vector<8x32xf32>
    %119 = arith.addf %73, %118 : vector<8x32xf32>
    %120 = vector.broadcast %11 : vector<1x32xf32> to vector<8x32xf32>
    %121 = arith.addf %119, %120 : vector<8x32xf32>
    %c0_41 = arith.constant 0 : index
    %c0_42 = arith.constant 0 : index
    %122 = vector.load %arg11[%c0_41, %c0_42] : memref<8x32xf32, #tpu.memory_space<vmem>>, vector<8x32xf32>
    tpu.vector_store %arg11[%c0_41, %c0_42], %121 {strides = array<i32>} : memref<8x32xf32, #tpu.memory_space<vmem>>, vector<8x32xf32>,
    %c1_i32 = arith.constant 1 : i32
    %123 = arith.cmpi eq, %arg1, %c1_i32 : i32
    %124 = arith.extui %123 : i1 to i32
    %c0_i32_43 = arith.constant 0 : i32
    %125 = arith.cmpi ne, %124, %c0_i32_43 : i32
    scf.if %125 {
      %c0_44 = arith.constant 0 : index
      %c0_45 = arith.constant 0 : index
      %126 = vector.load %arg9[%c0_44, %c0_45] : memref<2x32xf32, #tpu.memory_space<vmem>>, vector<2x32xf32>
      %127 = vector.extract_strided_slice %126 {offsets = [0, 0], sizes = [1, 32], strides = [1, 1]} : vector<2x32xf32> to vector<1x32xf32>
      %128 = vector.extract_strided_slice %126 {offsets = [1, 0], sizes = [1, 32], strides = [1, 1]} : vector<2x32xf32> to vector<1x32xf32>
      %cst_46 = arith.constant dense<0.000000e+00> : vector<8xf32>
      %129 = vector.multi_reduction <add>, %121, %cst_46 [1] : vector<8x32xf32> to vector<8xf32>
      %130 = vector.shape_cast %129 : vector<8xf32> to vector<8x1xf32>
      %cst_47 = arith.constant 3.200000e+01 : f32
      %131 = vector.broadcast %cst_47 : f32 to vector<8x1xf32>
      %132 = arith.divf %130, %131 : vector<8x1xf32>
      %133 = vector.broadcast %132 : vector<8x1xf32> to vector<8x32xf32>
      %134 = arith.subf %121, %133 : vector<8x32xf32>
      %135 = arith.mulf %134, %134 : vector<8x32xf32>
      %cst_48 = arith.constant dense<0.000000e+00> : vector<8xf32>
      %136 = vector.multi_reduction <add>, %135, %cst_48 [1] : vector<8x32xf32> to vector<8xf32>
      %137 = vector.shape_cast %136 : vector<8xf32> to vector<8x1xf32>
      %cst_49 = arith.constant 3.200000e+01 : f32
      %138 = vector.broadcast %cst_49 : f32 to vector<8x1xf32>
      %139 = arith.divf %137, %138 : vector<8x1xf32>
      %140 = vector.broadcast %132 : vector<8x1xf32> to vector<8x32xf32>
      %141 = arith.subf %121, %140 : vector<8x32xf32>
      %cst_50 = arith.constant 9.99999974E-6 : f32
      %142 = vector.broadcast %cst_50 : f32 to vector<8x1xf32>
      %143 = arith.addf %139, %142 : vector<8x1xf32>
      %144 = math.rsqrt %143 : vector<8x1xf32>
      %145 = vector.broadcast %144 : vector<8x1xf32> to vector<8x32xf32>
      %146 = arith.mulf %141, %145 : vector<8x32xf32>
      %147 = vector.broadcast %127 : vector<1x32xf32> to vector<8x32xf32>
      %148 = arith.mulf %146, %147 : vector<8x32xf32>
      %149 = vector.broadcast %128 : vector<1x32xf32> to vector<8x32xf32>
      %150 = arith.addf %148, %149 : vector<8x32xf32>
      %151 = vector.shape_cast %150 : vector<8x32xf32> to vector<1x8x32xf32>
      %c0_51 = arith.constant 0 : index
      %c0_52 = arith.constant 0 : index
      %c0_53 = arith.constant 0 : index
      %152 = vector.load %arg10[%c0_51, %c0_52, %c0_53] : memref<1x8x32xf32, #tpu.memory_space<vmem>>, vector<1x8x32xf32>
      tpu.vector_store %arg10[%c0_51, %c0_52, %c0_53], %151 {strides = array<i32>} : memref<1x8x32xf32, #tpu.memory_space<vmem>>, vector<1x8x32xf32>,
    } else {
    }
    return
  }
  func.func @transform_0(%arg0: i32, %arg1: i32) -> (i32, i32, i32) {
    %c0_i32 = arith.constant 0 : i32
    %c0_i32_0 = arith.constant 0 : i32
    %c0_i32_1 = arith.constant 0 : i32
    return %arg0, %c0_i32, %c0_i32_0 : i32, i32, i32
  }
  func.func @transform_1(%arg0: i32, %arg1: i32) -> (i32, i32, i32) {
    %c0_i32 = arith.constant 0 : i32
    %c0_i32_0 = arith.constant 0 : i32
    %c0_i32_1 = arith.constant 0 : i32
    return %arg1, %c0_i32, %c0_i32_0 : i32, i32, i32
  }
  func.func @transform_2(%arg0: i32, %arg1: i32) -> (i32, i32, i32) {
    %c0_i32 = arith.constant 0 : i32
    %c0_i32_0 = arith.constant 0 : i32
    %c0_i32_1 = arith.constant 0 : i32
    return %arg1, %c0_i32, %c0_i32_0 : i32, i32, i32
  }
  func.func @transform_3(%arg0: i32, %arg1: i32) -> (i32, i32, i32) {
    %c0_i32 = arith.constant 0 : i32
    %c0_i32_0 = arith.constant 0 : i32
    %c0_i32_1 = arith.constant 0 : i32
    return %arg1, %c0_i32, %c0_i32_0 : i32, i32, i32
  }
  func.func @transform_4(%arg0: i32, %arg1: i32) -> (i32, i32, i32) {
    %c0_i32 = arith.constant 0 : i32
    %c0_i32_0 = arith.constant 0 : i32
    %c0_i32_1 = arith.constant 0 : i32
    return %arg1, %c0_i32, %c0_i32_0 : i32, i32, i32
  }
  func.func @transform_5(%arg0: i32, %arg1: i32) -> (i32, i32, i32) {
    %c0_i32 = arith.constant 0 : i32
    %c0_i32_0 = arith.constant 0 : i32
    %c0_i32_1 = arith.constant 0 : i32
    return %arg1, %c0_i32, %c0_i32_0 : i32, i32, i32
  }
  func.func @transform_6(%arg0: i32, %arg1: i32) -> (i32, i32, i32) {
    %c0_i32 = arith.constant 0 : i32
    %c0_i32_0 = arith.constant 0 : i32
    %c0_i32_1 = arith.constant 0 : i32
    return %arg1, %c0_i32, %c0_i32_0 : i32, i32, i32
  }
  func.func @transform_7(%arg0: i32, %arg1: i32) -> (i32, i32) {
    %c0_i32 = arith.constant 0 : i32
    %c0_i32_0 = arith.constant 0 : i32
    %c0_i32_1 = arith.constant 0 : i32
    return %c0_i32, %c0_i32_0 : i32, i32
  }
  func.func @transform_8(%arg0: i32, %arg1: i32) -> (i32, i32, i32) {
    %c0_i32 = arith.constant 0 : i32
    %c0_i32_0 = arith.constant 0 : i32
    %c0_i32_1 = arith.constant 0 : i32
    return %arg0, %c0_i32, %c0_i32_0 : i32, i32, i32
  }
}

</mosaic_0001>

<bundles_post_ra>
// kernel: tpu_custom_call.1
= control target key start
LH: loop header
LB: loop body
LE: loop exit
PB: predicated region body
PF: predicated region fallthrough
CT: control target
= control target key end

     0   :  { %s4331_s0 = inlined_call_operand.vmem [shape: f32[2,8,32], index: 0, kind: input, shape index: {}]   ;;  %s4332_s1 = inlined_call_operand.vmem [shape: bf16[2,32,1536], index: 1, kind: input, shape index: {}]   ;;  %s4333_s2 = inlined_call_operand.vmem [shape: bf16[2,512,32], index: 2, kind: input, shape index: {}]   ;;  %s4334_s3 = inlined_call_operand.vmem [shape: bf16[2,32,128], index: 3, kind: input, shape index: {}]   ;;  %s4335_s4 = inlined_call_operand.vmem [shape: bf16[2,128,32], index: 4, kind: input, shape index: {}]   ;;  %s4336_s5 = inlined_call_operand.vmem [shape: f32[2,6,32], index: 5, kind: input, shape index: {}]   ;;  %s4337_s6 = inlined_call_operand.vmem [shape: f32[2,1,128], index: 6, kind: input, shape index: {}]   ;;  %s4338_s7 = inlined_call_operand.vmem [shape: f32[2,32], index: 7, kind: input, shape index: {}]   ;;  %s4339_s8 = inlined_call_operand.hbm [shape: f32[2,8,32], index: 8, kind: output, shape index: {}]  }
   0x1   :  { %4350 = sst [smem:[#allocation15_spill]] %s4331_s0 }
   0x2   :  { %4351 = sst [smem:[#allocation16_spill]] %s4332_s1 }
   0x3   :  { %4352 = sst [smem:[#allocation17_spill]] %s4339_s8 }
   0x4   :  { %13 = vsyncpa [#allocation4], 0 }
   0x5   :  { %15 = vsyncpa [#allocation4 + $0x1], 0  ;;  %s3509_s27 = smov 0   ;;  %s3511_s28 = smov 0  }
   0x6   :  { %s3513_s29 = smov 0   ;;  %s3515_s30 = smov 0  }
   0x7   :  { %s3517_s9 = smov 0   ;;  %s3519_s10 = smov 0  }
   0x8   :  { %s3521_s11 = smov 0   ;;  %s3523_s12 = smov 0  }
   0x9 LB: > { %4353 = sst [smem:[#allocation6_spill]] %s3430_s27  ;;  %s2820_s13 = sadd.s32 4294967295, %s3458_s12   ;;  %s3458_s12 = sphi %s3523_s12, %s21_s12   ;;  %s3454_s11 = sphi %s3521_s11, %s4376_s11   ;;  %s3450_s10 = sphi %s3519_s10, %s4375_s10   ;;  %s3446_s9 = sphi %s3517_s9, %s4374_s9   ;;  %s3442_s30 = sphi %s3515_s30, %s4373_s30   ;;  %s3438_s29 = sphi %s3513_s29, %s4372_s29   ;;  %s3434_s28 = sphi %s3511_s28, %s4378_s28   ;;  %s3430_s27 = sphi %s3509_s27, %s4377_s27  }
   0xa   : > { %4354 = sst [smem:[#allocation7_spill]] %s3438_s29  ;;  %s2821_s14 = sadd.s32 4294967294, %s3458_s12  }
   0xb   : > { %4355 = sst [smem:[#allocation8_spill]] %s3450_s10  ;;  %s30_s15 = sadd.s32 1, %s3450_s10 }
   0xc   : > { %4356 = sst [smem:[#allocation9_spill]] %s3454_s11  ;;  %p31_p0 = scmp.ge.s32.totalorder %s30_s15, 2 }
   0xd   : > { %4357 = sst [smem:[#allocation10_spill]] %s3458_s12  ;;  %s33_s16 = sadd.s32 1, %s3454_s11 }
   0xe   : > { %p253_p1 = scmp.ne.s32.totalorder %s3438_s29, %s3434_s28  ;;  %p254_p2 = scmp.eq.s32.totalorder %s2820_s13, 3 }
   0xf   : > { %s4380_s15 = smov (%p31_p0, %s30_s15), 0  ;;  %s4382_s16 = smov (!%p31_p0, %s33_s16), %s3454_s11 }
  0x10   : > { %4358 = sst [smem:[#allocation11_spill]] %s4380_s15  ;;  %p3558_p3 = por %p254_p2, %p253_p1 }
  0x11   : > { %p259_p4 = scmp.ne.s32.totalorder %s3434_s28, %s3430_s27  ;;  %p35_p5 = scmp.ge.s32.totalorder %s4382_s16, 2 }
  0x12   : > { %p260_p6 = scmp.eq.s32.totalorder %s2821_s14, 3  ;;  %p2824_p7 = scmp.ge.s32.totalorder %s3458_s12, 1 }
  0x13   : > { %p333_p8 = scmp.lt.s32.totalorder %s3458_s12, 5  ;;  %s4384_s16 = smov (%p35_p5, %s4382_s16), 0 }
  0x14   : > { %4360 = sst [smem:[#allocation12_spill]] %s4384_s16  ;;  %p3568_p9 = por %p260_p6, %p259_p4 }
  0x15   : > { %p334_p10 = pnand %p2824_p7, %p333_p8  ;;  %s240_s19 = ssub.s32 %s3454_s11, %s4384_s16 }
  0x16   : > { %s4361_s18 = scalar_select %p3568_p9, 1, 0 }
  0x17   : > { %s243_s20 = sadd.s32 1, %s3438_s29  ;;  %p241_p11 = scmp.eq.s32.totalorder %s240_s19, 0 }
  0x18   : > { %4362 = sst [smem:[#allocation13_spill]] %s4361_s18  ;;  %337 = sbr.rel (%p334_p10) target bundleno = 2332 (0x91c), region = 52 }
  0x19   : > { %s3576_s21 = scalar_select %p241_p11, %s3438_s29, %s243_s20  }
  0x1a   : > { %s4341_s22 = sand.u32 (!%p334_p10), 1, %s3434_s28   ;;  %p393_p12 = scmp.lt.s32.totalorder (!%p334_p10), %s3446_s9, 1 }
  0x1b   : > { %4363 = sst [smem:[#allocation14_spill]] %s3576_s21  ;;  %s3582_s23 = sshll.u32 (!%p334_p10), %s4341_s22, 3 }
  0x1c   : > { %p397_p13 = scmp.lt.s32.totalorder (!%p334_p10), %s3442_s30, 1  ;;  %s4364_s0 = sld [smem:[#allocation15_spill]] (!%p334_p10) }
  0x1d   : > { %s394_s24 = scalar_select %p393_p12, %s3446_s9, 1 }
  0x1e   : > { %s3587_s25 = scalar_select %p397_p13, %s3442_s30, 1 }
  0x1f   : > { %s2826_s26 = sshll.u32 %s394_s24, 3  ;;  %s4365_s1 = sld [smem:[#allocation16_spill]] }
  0x20   : > { %s3203_s20 = smul.u32 192, %s3587_s25  ;;  %s3134_s16 = sshll.u32 %s3587_s25, 8 }
  0x21   : > { %s3135_s22 = sshll.u32 %s3587_s25, 4  ;;  %s3603_s18 = scalar_lea.vmem %s4333_s2, %s3134_s16 }
  0x22   : > { %s396_s19 = scalar_lea.vmem %s4364_s0, %s2826_s26  ;;  %s3608_s24 = scalar_lea.vmem %s4334_s3, %s3135_s22 }
  0x23   : > { %s3136_s13 = sshll.u32 %s3587_s25, 6  ;;  %s2834_s8 = sshll.u32 %s3587_s25, 3 }
  0x24   : > { %s3614_s0 = scalar_lea.vmem %s4335_s4, %s3136_s13  ;;  %s423_s21 = scalar_lea.vmem %s4337_s6, %s3587_s25 }
  0x25   : > { %s3598_s10 = scalar_lea.vmem %s4365_s1, %s3203_s20  ;;  %s3620_s20 = scalar_lea.vmem %s4336_s5, %s2834_s8 }
  0x26   : > { %s392_s1 = scalar_lea.vmem [#allocation3], %s3582_s23  ;;  %p2835_p0 = scmp.ne.s32.totalorder %s3442_s30, 0 }
  0x28   : > { %428 = sbr.rel (%p2835_p0) target bundleno = 47 (0x2f), region = 56 }
  0x2d   : > { %v429_v0 = vld [vmem:[%s396_s19] sm:$0xff]  ;;  %vm430_vm0 = vcmask 261120  }
  0x2e   : > { %431 = vst.msk [vmem:[#allocation2] sm:$0xff] %vm430_vm0, %v429_v0 }
  0x2f PF: > { %vm435_vm1 = vcmask 261120   ;;  %v3460_v3 = vmov 32.0   ;;  %v2886_v15 = vld [vmem:[%s3598_s10 + $0x60] sm:$0xf]  ;;  %v3155_v16 = vld [vmem:[%s3598_s10 + $0x8c] sm:$0xf0] }
  0x30   : > { %3320 = vrcp.f32 %v3460_v3  ;;  %v3149_v17 = vld [vmem:[%s3598_s10 + $0x64] sm:$0xf]  ;;  %v2887_v18 = vor.u32 %v3155_v16, %v2886_v15  ;;  %v2888_v19 = vld [vmem:[%s3598_s10 + $0x90] sm:$0xf0]  ;;  %v3150_v20 = vld [vmem:[%s3598_s10 + $0x6c] sm:$0xf] }
  0x31   : > { %v2896_v21 = vld [vmem:[%s3598_s10 + $0x98] sm:$0xf0]  ;;  %v2891_v22 = vor.u32 %v3149_v17, %v2888_v19  ;;  %v3151_v24 = vld [vmem:[%s3598_s10 + $0x74] sm:$0xf]  ;;  %v2904_v25 = vld [vmem:[%s3598_s10 + $0xa0] sm:$0xf0] }
  0x32   : > { %v2899_v23 = vor.u32 %v3150_v20, %v2896_v21  ;;  %623 = vmatpush.bf16.msra.mxu0 %v2887_v18  ;;  %v2907_v26 = vor.u32 %v3151_v24, %v2904_v25  ;;  %v2838_v27 = vld [vmem:[%s3598_s10] sm:$0xf]  ;;  %v3143_v28 = vld [vmem:[%s3598_s10 + $0x2c] sm:$0xf0]  ;;  %v3137_v29 = vld [vmem:[%s3598_s10 + $0x4] sm:$0xf] }
  0x33   : > { %636 = vmatpush.bf16.msra.mxu2 %v2891_v22  ;;  %v2839_v30 = vor.u32 %v3143_v28, %v2838_v27  ;;  %v2840_v31 = vld [vmem:[%s3598_s10 + $0x30] sm:$0xf0]  ;;  %v3138_v32 = vld [vmem:[%s3598_s10 + $0xc] sm:$0xf]  ;;  %v2848_v33 = vld [vmem:[%s3598_s10 + $0x38] sm:$0xf0] }
  0x34   : > { %662 = vmatpush.bf16.msra.mxu3 %v2899_v23  ;;  %688 = vmatpush.bf16.msra.mxu1 %v2907_v26  ;;  %v2843_v34 = vor.u32 %v3137_v29, %v2840_v31  ;;  %v2851_v35 = vor.u32 %v3138_v32, %v2848_v33  ;;  %v3139_v36 = vld [vmem:[%s3598_s10 + $0x14] sm:$0xf]  ;;  %v2856_v37 = vld [vmem:[%s3598_s10 + $0x40] sm:$0xf0]  ;;  %v2894_v40 = vld [vmem:[%s3598_s10 + $0x68] sm:$0xf] }
  0x35   : > { %v432_v1 = vld [vmem:[#allocation2] sm:$0xff]  ;;  %v2859_v38 = vor.u32 %v3139_v36, %v2856_v37  ;;  %v3156_v41 = vld [vmem:[%s3598_s10 + $0x94] sm:$0xf0]  ;;  %v2902_v42 = vld [vmem:[%s3598_s10 + $0x70] sm:$0xf]  ;;  %vm822_vm6 = vcmask 1047556  }
  0x36   : > { %v436_v2 = vsel %vm435_vm1, %v432_v1, 0.0  ;;  %v3321_v4 = vpop.eup %3320  ;;  %624 = vmatpush.bf16.msra.mxu0 %v2839_v30  ;;  %v2895_v44 = vor.u32 %v3156_v41, %v2894_v40  ;;  %v3157_v45 = vld [vmem:[%s3598_s10 + $0x9c] sm:$0xf0]  ;;  %v3152_v46 = vld [vmem:[%s3598_s10 + $0x7c] sm:$0xf]  ;;  %s3461_s8 = smov 64  }
  0x37   : > { %437 = vadd.xlane.f32.xlu0 %v436_v2  ;;  %v440_v5 = vmul.f32 32.0, %v3321_v4  ;;  %vm444_vm2 = vweird.f32 %v3321_v4  ;;  %637 = vmatpush.bf16.msra.mxu2 %v2843_v34  ;;  %v2912_v47 = vld [vmem:[%s3598_s10 + $0xa8] sm:$0xf0]  ;;  %v2903_v48 = vor.u32 %v3157_v45, %v2902_v42  ;;  %v3153_v50 = vld [vmem:[%s3598_s10 + $0x84] sm:$0xf]  ;;  %vm1510_vm7 = vcmask 523264  }
  0x38   : > { %663 = vmatpush.bf16.msra.mxu3 %v2851_v35  ;;  %689 = vmatpush.bf16.msra.mxu1 %v2859_v38  ;;  %v2915_v49 = vor.u32 %v3152_v46, %v2912_v47  ;;  %v2920_v51 = vld [vmem:[%s3598_s10 + $0xb0] sm:$0xf0]  ;;  %v2846_v52 = vld [vmem:[%s3598_s10 + $0x8] sm:$0xf]  ;;  %v3144_v55 = vld [vmem:[%s3598_s10 + $0x34] sm:$0xf0] }
  0x39   : > { %v441_v6 = vsub.f32 1.0, %v440_v5  ;;  %v2923_v54 = vor.u32 %v3153_v50, %v2920_v51  ;;  %v2854_v56 = vld [vmem:[%s3598_s10 + $0x10] sm:$0xf]  ;;  %v2847_v57 = vor.u32 %v3144_v55, %v2846_v52  ;;  %v3145_v58 = vld [vmem:[%s3598_s10 + $0x3c] sm:$0xf0]  ;;  %vm1663_vm8 = vcmask 64512  }
  0x3a   : > { %675 = vmatpush.bf16.msrb.mxu0 %v2903_v48  ;;  %v3140_v59 = vld [vmem:[%s3598_s10 + $0x1c] sm:$0xf]  ;;  %v2864_v60 = vld [vmem:[%s3598_s10 + $0x48] sm:$0xf0]  ;;  %v2855_v61 = vor.u32 %v3145_v58, %v2854_v56  ;;  %v3141_v63 = vld [vmem:[%s3598_s10 + $0x24] sm:$0xf] }
  0x3b   : > { %v442_v7 = vmul.f32 %v3321_v4, %v441_v6  ;;  %649 = vmatpush.bf16.msrb.mxu2 %v2895_v44  ;;  %v2867_v62 = vor.u32 %v3140_v59, %v2864_v60  ;;  %v2872_v0 = vld [vmem:[%s3598_s10 + $0x50] sm:$0xf0]  ;;  %v433_v6 = vld [vmem:[%s3620_s20] sm:$0x3f]  ;;  %v2910_v16 = vld [vmem:[%s3598_s10 + $0x78] sm:$0xf] }
  0x3c   : > { %714 = vmatpush.bf16.msrb.mxu3 %v2915_v49  ;;  %740 = vmatpush.bf16.msrb.mxu1 %v2923_v54  ;;  %v3158_v17 = vld [vmem:[%s3598_s10 + $0xa4] sm:$0xf0]  ;;  %v2918_v18 = vld [vmem:[%s3598_s10 + $0x80] sm:$0xf]  ;;  %v3159_v19 = vld [vmem:[%s3598_s10 + $0xac] sm:$0xf0] }
  0x3d   : > { %v443_v8 = vadd.f32 %v3321_v4, %v442_v7  ;;  %v3154_v21 = vld [vmem:[%s3598_s10 + $0x8c] sm:$0xf]  ;;  %v2928_v22 = vld [vmem:[%s3598_s10 + $0xb8] sm:$0xf0]  ;;  %v2911_v24 = vor.u32 %v3158_v17, %v2910_v16  ;;  %v2919_v25 = vor.u32 %v3159_v19, %v2918_v18  ;;  %v2862_v26 = vld [vmem:[%s3598_s10 + $0x18] sm:$0xf] }
  0x3e   : > { %676 = vmatpush.bf16.msrb.mxu0 %v2855_v61  ;;  %v2931_v27 = vor.u32 %v3154_v21, %v2928_v22  ;;  %v3146_v28 = vld [vmem:[%s3598_s10 + $0x44] sm:$0xf0]  ;;  %v2870_v29 = vld [vmem:[%s3598_s10 + $0x20] sm:$0xf]  ;;  %v3147_v30 = vld [vmem:[%s3598_s10 + $0x4c] sm:$0xf0] }
  0x3f   : > { %v3629_v9 = vsel %vm444_vm2, %v3321_v4, %v443_v8  ;;  %650 = vmatpush.bf16.msrb.mxu2 %v2847_v57  ;;  %v2880_v31 = vld [vmem:[%s3598_s10 + $0x58] sm:$0xf0]  ;;  %v2863_v32 = vor.u32 %v3146_v28, %v2862_v26  ;;  %v2871_v33 = vor.u32 %v3147_v30, %v2870_v29  ;;  %v2926_v35 = vld [vmem:[%s3598_s10 + $0x88] sm:$0xf]  ;;  %v3160_v36 = vld [vmem:[%s3598_s10 + $0xb4] sm:$0xf0] }
  0x40   : > { %715 = vmatpush.bf16.msrb.mxu3 %v2867_v62  ;;  %v2927_v37 = vor.u32 %v3160_v36, %v2926_v35  ;;  %v2878_v38 = vld [vmem:[%s3598_s10 + $0x28] sm:$0xf]  ;;  %vm1771_vm9 = vcmask 1043456   ;;  %p3129_p1 = scmp.ne.s32.totalorder %s3442_s30, 1 }
  0xaa   : > { %v438_v10 = vpop.xlane.xlu0 %437 }
  0xab   : > { %v446_v11 = vmul.f32 %v3629_v9, %v438_v10  ;;  %v465_v10 = vperm.slane %v433_v6, 0 }
  0xad   : > { %v3632_v12 = vsub.f32 %v432_v1, %v446_v11  ;;  %v2875_v1 = vor.u32 %v3141_v63, %v2872_v0 }
  0xaf   : > { %v448_v13 = vmul.f32 %v3632_v12, %v3632_v12  ;;  %741 = vmatpush.bf16.msrb.mxu1 %v2875_v1 }
  0xb1   : > { %v449_v14 = vsel %vm435_vm1, %v448_v13, 0.0  ;;  %v467_v13 = vperm.slane %v433_v6, 1 }
  0xb2   : > { %450 = vadd.xlane.f32.xlu0 %v449_v14 }
 0x125   : > { %v451_v39 = vpop.xlane.xlu0 %450 }
 0x126   : > { %v452_v43 = vmul.f32 %v451_v39, %v3629_v9  ;;  %v3148_v39 = vld [vmem:[%s3598_s10 + $0x54] sm:$0xf0] }
 0x127   : > { %v2879_v40 = vor.u32 %v3148_v39, %v2878_v38  ;;  %v3463_v38 = vmov 1934713408  }
 0x128   : > { %v453_v53 = vadd.f32 1e-05, %v452_v43  ;;  %v875_v39 = vunpack.c.l.s4 %v3463_v38 }
 0x12a   : > { %3322 = vrsqrt.f32 %v453_v53  ;;  %vm460_vm4 = vweird.f32 %v453_v53 }
 0x130   : > { %v3323_v2 = vpop.eup %3322 }
 0x131   : > { %v455_v3 = vmul.f32 %v3323_v2, %v453_v53  ;;  %vm461_vm3 = vweird.f32 %v3323_v2 }
 0x132   : > { %vm462_vm5 = vmor %vm460_vm4, %vm461_vm3 }
 0x133   : > { %v456_v4 = vmul.f32 %v3323_v2, %v455_v3 }
 0x135   : > { %v457_v5 = vmul.f32 0.5, %v456_v4 }
 0x137   : > { %v458_v7 = vsub.f32 1.5, %v457_v5 }
 0x139   : > { %v459_v8 = vmul.f32 %v3323_v2, %v458_v7 }
 0x13b   : > { %v463_v11 = vsel %vm462_vm5, %v3323_v2, %v459_v8 }
 0x13c   : > { %v464_v14 = vmul.f32 %v463_v11, %v3632_v12  ;;  %v3142_v12 = vld [vmem:[%s3598_s10 + $0x2c] sm:$0xf] }
 0x13d   : > { %v2883_v34 = vor.u32 %v3142_v12, %v2880_v31 }
 0x13e   : > { %v466_v15 = vmul.f32 %v465_v10, %v464_v14 }
 0x140   : > { %v468_v20 = vadd.f32 %v467_v13, %v466_v15 }
 0x142   : > { %v469_v23 = vpack.c.bf16 %v468_v20, %v468_v20 }
 0x144   : > { %2932 = vmatmul.msk.bf16.vlgmr.msra.gmra.mxu0 %vm435_vm1, %v469_v23  ;;  %2933 = vmatmul.msk.bf16.vlgmr.msra.gmra.mxu2 %vm435_vm1, %v469_v23 }
 0x145   : > { %2935 = vmatmul.msk.bf16.vlgmr.msra.gmra.mxu3 %vm435_vm1, %v469_v23  ;;  %2937 = vmatmul.msk.bf16.vlgmr.msra.gmra.mxu1 %vm435_vm1, %v469_v23 }
 0x146   : > { %701 = vmatpush.bf16.msra.mxu2 %v2911_v24  ;;  %727 = vmatpush.bf16.msra.mxu0 %v2919_v25 }
 0x147   : > { %766 = vmatpush.bf16.msra.mxu3 %v2931_v27 }
 0x14a   : > { %702 = vmatpush.bf16.msra.mxu2 %v2863_v32  ;;  %728 = vmatpush.bf16.msra.mxu0 %v2871_v33  ;;  %v3462_v32 = vmov 1983009808  }
 0x14b   : > { %767 = vmatpush.bf16.msra.mxu3 %v2883_v34  ;;  %v827_v33 = vunpack.c.l.s4 %v3462_v32 }
 0x14d   : > { %v3754_v35 = vunpack.c.0.s8 %v827_v33 }
 0x154   : > { %2934 = vmatmul.msk.bf16.vlgmr.msrb.gmra.mxu2 %vm435_vm1, %v469_v23  ;;  %2936 = vmatmul.msk.bf16.vlgmr.msrb.gmra.mxu0 %vm435_vm1, %v469_v23 }
 0x155   : > { %2939 = vmatmul.msk.bf16.vlgmr.msrb.gmra.mxu3 %vm435_vm1, %v469_v23  ;;  %2941 = vmatmul.msk.bf16.vlgmr.msrb.gmra.mxu1 %vm435_vm1, %v469_v23 }
 0x156   : > { %753 = vmatpush.bf16.msrb.mxu2 %v2927_v37 }
 0x15a   : > { %754 = vmatpush.bf16.msrb.mxu2 %v2879_v40 }
 0x164   : > { %2938 = vmatmul.msk.bf16.vlgmr.msra.gmra.mxu2 %vm435_vm1, %v469_v23  ;;  %2940 = vmatmul.msk.bf16.vlgmr.msra.gmra.mxu0 %vm435_vm1, %v469_v23 }
 0x165   : > { %2943 = vmatmul.msk.bf16.vlgmr.msra.gmra.mxu3 %vm435_vm1, %v469_v23 }
 0x174   : > { %2942 = vmatmul.msk.bf16.vlgmr.msrb.gmra.mxu2 %vm435_vm1, %v469_v23 }
 0x1c1   : > { %v626_v41 = vpop.f32.mrf.mxu0 }
 0x1c2   : > { %v691_v42 = vpop.f32.mrf.mxu1  ;;  %v824_v43 = vrot.slane %v626_v41, 4 }
 0x1c3   : > { %v934_v53 = vrot.slane %v691_v42, 4 }
 0x1c7   : > { %v639_v44 = vpop.f32.mrf.mxu2 }
 0x1c8   : > { %v821_v45 = vrot.slane %v639_v44, 4  ;;  %v3701_v46 = vsel %vm822_vm6, %v639_v44, %v824_v43  ;;  %v665_v47 = vpop.f32.mrf.mxu3 }
 0x1c9   : > { %v628_v48 = vpop.f32.mrf.mxu0  ;;  %v3289_v49 = vpack.i.bf16 %v639_v44, %v665_v47  ;;  %v846_v60 = vrot.slane %v665_v47, 4 }
 0x1ca   : > { %v823_v50 = vsel %vm822_vm6, %v821_v45, %v626_v41  ;;  %v693_v51 = vpop.f32.mrf.mxu1 }
 0x1cb   : > { %3290 = vrot.lane.b32.xlu2 %v3289_v49, %s3461_s8  ;;  %v829_v40 = vperm.slane %v823_v50, %v3754_v35  ;;  %v3761_v51 = vunpack.c.0.s8 %v875_v39 }
 0x1cf   : > { %v641_v52 = vpop.f32.mrf.mxu2 }
 0x1d0   : > { %v667_v54 = vpop.f32.mrf.mxu3 }
 0x1d1   : > { %v678_v55 = vpop.f32.mrf.mxu0 }
 0x1d2   : > { %v3706_v56 = vsel %vm822_vm6, %v934_v53, %v678_v55  ;;  %v936_v57 = vrot.slane %v678_v55, 4  ;;  %v3708_v58 = vpop.f32.mrf.mxu1 }
 0x1d3   : > { %v1046_v7 = vrot.slane %v3708_v58, 4 }
 0x1d4   : > { %v3711_v59 = vsel %vm822_vm6, %v691_v42, %v936_v57 }
 0x1d7   : > { %v652_v61 = vpop.f32.mrf.mxu2 }
 0x1d8   : > { %v847_v62 = vsel %vm822_vm6, %v846_v60, %v652_v61  ;;  %v848_v63 = vrot.slane %v652_v61, 4  ;;  %v3294_v0 = vpack.i.bf16 %v626_v41, %v652_v61  ;;  %v717_v1 = vpop.f32.mrf.mxu3  ;;  %v833_v41 = vperm.slane %v3701_v46, %v3754_v35 }
 0x1d9   : > { %v680_v2 = vpop.f32.mrf.mxu0  ;;  %v3279_v3 = vpack.i.bf16 %v691_v42, %v717_v1  ;;  %v958_v15 = vrot.slane %v717_v1, 4  ;;  %v853_v42 = vperm.slane %v847_v62, %v3754_v35 }
 0x1da   : > { %v849_v4 = vsel %vm822_vm6, %v665_v47, %v848_v63  ;;  %v745_v5 = vpop.f32.mrf.mxu1  ;;  %3295 = vrot.lane.b32.xlu2 %v3294_v0, %s3461_s8  ;;  %v884_v60 = vrot.slane %v833_v41, 4 }
 0x1db   : > { %3280 = vrot.lane.b32.xlu1 %v3279_v3, %s3461_s8  ;;  %v857_v49 = vperm.slane %v849_v4, %v3754_v35  ;;  %v896_v61 = vrot.slane %v853_v42, 4 }
 0x1dd   : > { %v908_v4 = vrot.slane %v857_v49, 4 }
 0x1df   : > { %v654_v6 = vpop.f32.mrf.mxu2 }
 0x1e0   : > { %v719_v8 = vpop.f32.mrf.mxu3 }
 0x1e1   : > { %v3718_v10 = vpop.f32.mrf.mxu0 }
 0x1e2   : > { %v3722_v11 = vsel %vm822_vm6, %v1046_v7, %v3718_v10  ;;  %v1048_v13 = vrot.slane %v3718_v10, 4 }
 0x1e4   : > { %v3727_v14 = vsel %vm822_vm6, %v3708_v58, %v1048_v13 }
 0x1e7   : > { %v704_v16 = vpop.f32.mrf.mxu2 }
 0x1e8   : > { %v3730_v17 = vsel %vm822_vm6, %v958_v15, %v704_v16  ;;  %v960_v18 = vrot.slane %v704_v16, 4  ;;  %v3284_v19 = vpack.i.bf16 %v678_v55, %v704_v16  ;;  %v3732_v20 = vpop.f32.mrf.mxu3  ;;  %v872_v55 = vrot.slane %v829_v40, 4 }
 0x1e9   : > { %v3299_v21 = vpack.i.bf16 %v3708_v58, %v3732_v20  ;;  %v732_v22 = vpop.f32.mrf.mxu0  ;;  %v1070_v26 = vrot.slane %v3732_v20, 4 }
 0x1ea   : > { %v3737_v23 = vsel %vm822_vm6, %v717_v1, %v960_v18  ;;  %3285 = vrot.lane.b32.xlu1 %v3284_v19, %s3461_s8 }
 0x1ef   : > { %v706_v24 = vpop.f32.mrf.mxu2 }
 0x1f0   : > { %v771_v25 = vpop.f32.mrf.mxu3 }
 0x1f7   : > { %v3741_v27 = vpop.f32.mrf.mxu2 }
 0x1f8   : > { %v3745_v28 = vsel %vm822_vm6, %v1070_v26, %v3741_v27  ;;  %v1072_v29 = vrot.slane %v3741_v27, 4  ;;  %v3304_v30 = vpack.i.bf16 %v3718_v10, %v3741_v27 }
 0x1fa   : > { %v3752_v12 = vsel %vm822_vm6, %v3732_v20, %v1072_v29 }
 0x1ff   : > { %v758_v31 = vpop.f32.mrf.mxu2 }
 0x225   : > { %v3291_v34 = vpop.permute.xlu2 %3290 }
 0x226   : > { %v3293_v36 = vunpack.i.h.bf16 %v3291_v34  ;;  %v3292_v37 = vunpack.i.l.bf16 %v3291_v34 }
 0x228   : > { %v834_v44 = vrot.slane %v3293_v36, 4  ;;  %v858_v45 = vrot.slane %v3292_v37, 4 }
 0x234   : > { %v3296_v43 = vpop.permute.xlu2 %3295 }
 0x235   : > { %v3298_v47 = vunpack.i.h.bf16 %v3296_v43  ;;  %v3297_v48 = vunpack.i.l.bf16 %v3296_v43 }
 0x237   : > { %v835_v52 = vsel %vm822_vm6, %v834_v44, %v3298_v47  ;;  %v836_v53 = vrot.slane %v3298_v47, 4  ;;  %v859_v54 = vsel %vm822_vm6, %v858_v45, %v3297_v48  ;;  %v860_v50 = vrot.slane %v3297_v48, 4 }
 0x238   : > { %v841_v46 = vperm.slane %v835_v52, %v3754_v35  ;;  %v865_v57 = vperm.slane %v859_v54, %v3754_v35 }
 0x239   : > { %v837_v62 = vsel %vm822_vm6, %v3293_v36, %v836_v53  ;;  %v861_v63 = vsel %vm822_vm6, %v3292_v37, %v860_v50 }
 0x23a   : > { %v845_v0 = vperm.slane %v837_v62, %v3754_v35  ;;  %v870_v1 = vrot.slane %v841_v46, 4  ;;  %v869_v2 = vperm.slane %v861_v63, %v3754_v35  ;;  %v873_v3 = vsel %vm822_vm6, %v841_v46, %v872_v55 }
 0x23b   : > { %v881_v5 = vperm.slane %v873_v3, %v3761_v51  ;;  %v894_v6 = vrot.slane %v865_v57, 4  ;;  %v897_v7 = vsel %vm822_vm6, %v865_v57, %v896_v61 }
 0x23c   : > { %v882_v8 = vrot.slane %v845_v0, 4  ;;  %v871_v13 = vsel %vm822_vm6, %v870_v1, %v829_v40  ;;  %v885_v15 = vsel %vm822_vm6, %v845_v0, %v884_v60  ;;  %v905_v16 = vperm.slane %v897_v7, %v3761_v51 }
 0x23d   : > { %v877_v18 = vperm.slane %v871_v13, %v3761_v51  ;;  %v893_v19 = vperm.slane %v885_v15, %v3761_v51  ;;  %v895_v22 = vsel %vm822_vm6, %v894_v6, %v853_v42  ;;  %v906_v24 = vrot.slane %v869_v2, 4 }
 0x23e   : > { %v883_v25 = vsel %vm822_vm6, %v882_v8, %v833_v41  ;;  %v901_v26 = vperm.slane %v895_v22, %v3761_v51  ;;  %v909_v29 = vsel %vm822_vm6, %v869_v2, %v908_v4  ;;  %v922_v31 = vrot.slane %v905_v16, 4 }
 0x23f   : > { %v889_v32 = vperm.slane %v883_v25, %v3761_v51  ;;  %v907_v33 = vsel %vm822_vm6, %v906_v24, %v857_v49  ;;  %v917_v34 = vperm.slane %v909_v29, %v3761_v51  ;;  %v920_v36 = vrot.slane %v877_v18, 4 }
 0x240   : > { %v913_v37 = vperm.slane %v907_v33, %v3761_v51  ;;  %v918_v38 = vrot.slane %v901_v26, 4  ;;  %v923_v39 = vsel %vm822_vm6, %v922_v31, %v881_v5  ;;  %v924_v40 = vrot.slane %v881_v5, 4 }
 0x241   : > { %v921_v41 = vsel %vm822_vm6, %v901_v26, %v920_v36  ;;  %v928_v42 = vrot.slane %v889_v32, 4  ;;  %v930_v43 = vrot.slane %v917_v34, 4  ;;  %v932_v44 = vrot.slane %v893_v19, 4 }
 0x242   : > { %v919_v45 = vsel %vm822_vm6, %v918_v38, %v877_v18  ;;  %v925_v47 = vsel %vm822_vm6, %v905_v16, %v924_v40  ;;  %v926_v48 = vrot.slane %v913_v37, 4  ;;  %v1158_v49 = vrot.slane %v923_v39, 4 }
 0x243   : > { %v929_v52 = vsel %vm822_vm6, %v913_v37, %v928_v42  ;;  %v931_v53 = vsel %vm822_vm6, %v930_v43, %v893_v19  ;;  %v933_v54 = vsel %vm822_vm6, %v917_v34, %v932_v44  ;;  %v1160_v50 = vrot.slane %v919_v45, 4 }
 0x244   : > { %v927_v55 = vsel %vm822_vm6, %v926_v48, %v889_v32  ;;  %v1159_v46 = vsel %vm822_vm6, %v1158_v49, %v919_v45  ;;  %v1170_v57 = vrot.slane %v925_v47, 4  ;;  %v1172_v60 = vrot.slane %v921_v41, 4 }
 0x245   : > { %v1161_v61 = vsel %vm822_vm6, %v923_v39, %v1160_v50  ;;  %v1165_v62 = vperm.slane %v1159_v46, %v3754_v35  ;;  %v1182_v63 = vrot.slane %v931_v53, 4  ;;  %v1184_v0 = vrot.slane %v927_v55, 4 }
 0x246   : > { %v1169_v1 = vperm.slane %v1161_v61, %v3754_v35  ;;  %v1171_v2 = vsel %vm822_vm6, %v1170_v57, %v921_v41  ;;  %v1173_v3 = vsel %vm822_vm6, %v925_v47, %v1172_v60  ;;  %v1194_v4 = vrot.slane %v933_v54, 4 }
 0x247   : > { %v1177_v5 = vperm.slane %v1171_v2, %v3754_v35  ;;  %v1181_v6 = vperm.slane %v1173_v3, %v3754_v35  ;;  %v1185_v7 = vsel %vm822_vm6, %v931_v53, %v1184_v0  ;;  %v1196_v8 = vrot.slane %v929_v52, 4 }
 0x248   : > { %v1195_v13 = vsel %vm822_vm6, %v1194_v4, %v929_v52  ;;  %v1220_v15 = vrot.slane %v1169_v1, 4  ;;  %v1183_v16 = vsel %vm822_vm6, %v1182_v63, %v927_v55  ;;  %v1208_v18 = vrot.slane %v1165_v62, 4 }
 0x249   : > { %v1197_v19 = vsel %vm822_vm6, %v933_v54, %v1196_v8  ;;  %v1218_v22 = vrot.slane %v1181_v6, 4  ;;  %v1189_v24 = vperm.slane %v1183_v16, %v3754_v35  ;;  %v1201_v25 = vperm.slane %v1195_v13, %v3754_v35 }
 0x24a   : > { %v1205_v26 = vperm.slane %v1197_v19, %v3754_v35  ;;  %v1206_v29 = vrot.slane %v1177_v5, 4  ;;  %v1209_v31 = vsel %vm822_vm6, %v1177_v5, %v1208_v18  ;;  %v1193_v32 = vperm.slane %v1185_v7, %v3754_v35 }
 0x24b   : > { %v1230_v33 = vrot.slane %v1201_v25, 4  ;;  %v1217_v34 = vperm.slane %v1209_v31, %v3761_v51  ;;  %v1232_v36 = vrot.slane %v1189_v24, 4  ;;  %v1219_v37 = vsel %vm822_vm6, %v1218_v22, %v1169_v1 }
 0x24c   : > { %v1207_v38 = vsel %vm822_vm6, %v1206_v29, %v1165_v62  ;;  %v1225_v39 = vperm.slane %v1219_v37, %v3761_v51  ;;  %v1242_v40 = vrot.slane %v1205_v26, 4  ;;  %v1221_v41 = vsel %vm822_vm6, %v1181_v6, %v1220_v15 }
 0x24d   : > { %v1213_v42 = vperm.slane %v1207_v38, %v3761_v51  ;;  %v1231_v43 = vsel %vm822_vm6, %v1230_v33, %v1189_v24  ;;  %v1233_v44 = vsel %vm822_vm6, %v1201_v25, %v1232_v36  ;;  %v1260_v45 = vrot.slane %v1217_v34, 4  ;;  %v3281_v3 = vpop.permute.xlu1 %3280 }
 0x24e   : > { %v1237_v47 = vperm.slane %v1231_v43, %v3761_v51  ;;  %v1241_v48 = vperm.slane %v1233_v44, %v3761_v51  ;;  %v1243_v52 = vsel %vm822_vm6, %v1242_v40, %v1193_v32  ;;  %v1264_v53 = vrot.slane %v1225_v39, 4 }
 0x24f   : > { %v1256_v49 = vrot.slane %v1213_v42, 4  ;;  %v1229_v54 = vperm.slane %v1221_v41, %v3761_v51  ;;  %v1249_v60 = vperm.slane %v1243_v52, %v3761_v51  ;;  %v1244_v62 = vrot.slane %v1193_v32, 4 }
 0x250   : > { %v3825_v50 = vsel %vm822_vm6, %v1241_v48, %v1260_v45  ;;  %v1254_v55 = vrot.slane %v1237_v47, 4  ;;  %v1258_v57 = vrot.slane %v1241_v48, 4  ;;  %v3283_v13 = vunpack.i.h.bf16 %v3281_v3 }
 0x251   : > { %v3828_v46 = vsel %vm822_vm6, %v1237_v47, %v1256_v49  ;;  %v3838_v0 = vsel %vm822_vm6, %v1249_v60, %v1264_v53  ;;  %v1268_v1 = vrot.slane %v1229_v54, 4  ;;  %v1262_v2 = vrot.slane %v1249_v60, 4 }
 0x252   : > { %v3832_v61 = vsel %vm822_vm6, %v1254_v55, %v1213_v42  ;;  %v3835_v63 = vsel %vm822_vm6, %v1258_v57, %v1217_v34  ;;  %v1245_v4 = vsel %vm822_vm6, %v1205_v26, %v1244_v62  ;;  %v3282_v15 = vunpack.i.l.bf16 %v3281_v3 }
 0x253   : > { %v1253_v5 = vperm.slane %v1245_v4, %v3761_v51  ;;  %v3843_v6 = vsel %vm822_vm6, %v1262_v2, %v1225_v39  ;;  %v941_v18 = vperm.slane %v3706_v56, %v3754_v35  ;;  %v945_v19 = vperm.slane %v3711_v59, %v3754_v35 }
 0x254   : > { %v965_v22 = vperm.slane %v3730_v17, %v3754_v35  ;;  %v946_v25 = vrot.slane %v3283_v13, 4  ;;  %v970_v26 = vrot.slane %v3282_v15, 4  ;;  %v969_v32 = vperm.slane %v3737_v23, %v3754_v35 }
 0x255   : > { %v3846_v7 = vsel %vm822_vm6, %v1253_v5, %v1268_v1  ;;  %v1266_v8 = vrot.slane %v1253_v5, 4  ;;  %v984_v37 = vrot.slane %v941_v18, 4  ;;  %v996_v17 = vrot.slane %v945_v19, 4 }
 0x256   : > { %v1008_v39 = vrot.slane %v965_v22, 4  ;;  %v1020_v45 = vrot.slane %v969_v32, 4 }
 0x257   : > { %v3849_v16 = vsel %vm822_vm6, %v1266_v8, %v1229_v54 }
 0x25c   : > { %v3286_v24 = vpop.permute.xlu1 %3285 }
 0x25d   : > { %v3288_v29 = vunpack.i.h.bf16 %v3286_v24  ;;  %v3287_v31 = vunpack.i.l.bf16 %v3286_v24 }
 0x25f   : > { %v947_v33 = vsel %vm822_vm6, %v946_v25, %v3288_v29  ;;  %v948_v34 = vrot.slane %v3288_v29, 4  ;;  %v971_v36 = vsel %vm822_vm6, %v970_v26, %v3287_v31  ;;  %v972_v56 = vrot.slane %v3287_v31, 4 }
 0x260   : > { %v953_v59 = vperm.slane %v947_v33, %v3754_v35  ;;  %v977_v38 = vperm.slane %v971_v36, %v3754_v35 }
 0x261   : > { %v949_v40 = vsel %vm822_vm6, %v3283_v13, %v948_v34  ;;  %v973_v41 = vsel %vm822_vm6, %v3282_v15, %v972_v56 }
 0x262   : > { %v957_v42 = vperm.slane %v949_v40, %v3754_v35  ;;  %v982_v23 = vrot.slane %v953_v59, 4  ;;  %v981_v43 = vperm.slane %v973_v41, %v3754_v35  ;;  %v985_v44 = vsel %vm822_vm6, %v953_v59, %v984_v37 }
 0x263   : > { %v993_v47 = vperm.slane %v985_v44, %v3761_v51  ;;  %v1006_v48 = vrot.slane %v977_v38, 4  ;;  %v1009_v49 = vsel %vm822_vm6, %v977_v38, %v1008_v39 }
 0x264   : > { %v994_v52 = vrot.slane %v957_v42, 4  ;;  %v983_v53 = vsel %vm822_vm6, %v982_v23, %v941_v18  ;;  %v997_v54 = vsel %vm822_vm6, %v957_v42, %v996_v17  ;;  %v1017_v55 = vperm.slane %v1009_v49, %v3761_v51 }
 0x265   : > { %v989_v57 = vperm.slane %v983_v53, %v3761_v51  ;;  %v1005_v60 = vperm.slane %v997_v54, %v3761_v51  ;;  %v1007_v62 = vsel %vm822_vm6, %v1006_v48, %v965_v22  ;;  %v1018_v1 = vrot.slane %v981_v43, 4 }
 0x266   : > { %v995_v2 = vsel %vm822_vm6, %v994_v52, %v945_v19  ;;  %v1013_v3 = vperm.slane %v1007_v62, %v3761_v51  ;;  %v1021_v4 = vsel %vm822_vm6, %v981_v43, %v1020_v45  ;;  %v1034_v5 = vrot.slane %v1017_v55, 4 }
 0x267   : > { %v1001_v8 = vperm.slane %v995_v2, %v3761_v51  ;;  %v1019_v13 = vsel %vm822_vm6, %v1018_v1, %v969_v32  ;;  %v1029_v15 = vperm.slane %v1021_v4, %v3761_v51  ;;  %v1032_v18 = vrot.slane %v989_v57, 4 }
 0x268   : > { %v1025_v24 = vperm.slane %v1019_v13, %v3761_v51  ;;  %v1030_v25 = vrot.slane %v1013_v3, 4  ;;  %v1035_v22 = vsel %vm822_vm6, %v1034_v5, %v993_v47  ;;  %v1036_v26 = vrot.slane %v993_v47, 4 }
 0x269   : > { %v1033_v19 = vsel %vm822_vm6, %v1013_v3, %v1032_v18  ;;  %v1040_v29 = vrot.slane %v1001_v8, 4  ;;  %v1042_v31 = vrot.slane %v1029_v15, 4  ;;  %v1044_v33 = vrot.slane %v1005_v60, 4 }
 0x26a   : > { %v1031_v34 = vsel %vm822_vm6, %v1030_v25, %v989_v57  ;;  %v1037_v36 = vsel %vm822_vm6, %v1017_v55, %v1036_v26  ;;  %v1038_v56 = vrot.slane %v1025_v24, 4  ;;  %v1270_v32 = vrot.slane %v1035_v22, 4 }
 0x26b   : > { %v1043_v37 = vsel %vm822_vm6, %v1042_v31, %v1005_v60  ;;  %v1045_v59 = vsel %vm822_vm6, %v1029_v15, %v1044_v33  ;;  %v1272_v38 = vrot.slane %v1031_v34, 4  ;;  %v1282_v17 = vrot.slane %v1037_v36, 4 }
 0x26c   : > { %v1284_v39 = vrot.slane %v1033_v19, 4  ;;  %v1294_v40 = vrot.slane %v1043_v37, 4  ;;  %v1306_v41 = vrot.slane %v1045_v59, 4  ;;  %v1039_v42 = vsel %vm822_vm6, %v1038_v56, %v1001_v8 }
 0x26d   : > { %v1041_v23 = vsel %vm822_vm6, %v1025_v24, %v1040_v29  ;;  %v1271_v43 = vsel %vm822_vm6, %v1270_v32, %v1031_v34  ;;  %v1283_v44 = vsel %vm822_vm6, %v1282_v17, %v1033_v19  ;;  %v1296_v45 = vrot.slane %v1039_v42, 4 }
 0x26e   : > { %v1285_v47 = vsel %vm822_vm6, %v1037_v36, %v1284_v39  ;;  %v1277_v48 = vperm.slane %v1271_v43, %v3754_v35  ;;  %v1289_v49 = vperm.slane %v1283_v44, %v3754_v35  ;;  %v1295_v52 = vsel %vm822_vm6, %v1294_v40, %v1039_v42 }
 0x26f   : > { %v1301_v53 = vperm.slane %v1295_v52, %v3754_v35  ;;  %v1307_v54 = vsel %vm822_vm6, %v1306_v41, %v1041_v23  ;;  %v1308_v55 = vrot.slane %v1041_v23, 4  ;;  %v1273_v57 = vsel %vm822_vm6, %v1035_v22, %v1272_v38 }
 0x270   : > { %v1313_v60 = vperm.slane %v1307_v54, %v3754_v35  ;;  %v1318_v62 = vrot.slane %v1289_v49, 4  ;;  %v1320_v1 = vrot.slane %v1277_v48, 4  ;;  %v1281_v2 = vperm.slane %v1273_v57, %v3754_v35 }
 0x271   : > { %v1344_v3 = vrot.slane %v1301_v53, 4  ;;  %v1293_v4 = vperm.slane %v1285_v47, %v3754_v35  ;;  %v1297_v5 = vsel %vm822_vm6, %v1043_v37, %v1296_v45  ;;  %v1309_v8 = vsel %vm822_vm6, %v1045_v59, %v1308_v55 }
 0x272   : > { %v1319_v13 = vsel %vm822_vm6, %v1318_v62, %v1277_v48  ;;  %v1342_v15 = vrot.slane %v1313_v60, 4  ;;  %v1321_v18 = vsel %vm822_vm6, %v1289_v49, %v1320_v1  ;;  %v1305_v24 = vperm.slane %v1297_v5, %v3754_v35 }
 0x273   : > { %v1325_v25 = vperm.slane %v1319_v13, %v3761_v51  ;;  %v1329_v22 = vperm.slane %v1321_v18, %v3761_v51  ;;  %v1345_v26 = vsel %vm822_vm6, %v1313_v60, %v1344_v3  ;;  %v1317_v19 = vperm.slane %v1309_v8, %v3754_v35 }
 0x274   : > { %v1343_v29 = vsel %vm822_vm6, %v1342_v15, %v1301_v53  ;;  %v1353_v31 = vperm.slane %v1345_v26, %v3761_v51  ;;  %v1330_v33 = vrot.slane %v1293_v4, 4  ;;  %v1332_v34 = vrot.slane %v1281_v2, 4 }
 0x275   : > { %v1349_v36 = vperm.slane %v1343_v29, %v3761_v51  ;;  %v1368_v56 = vrot.slane %v1325_v25, 4  ;;  %v1372_v32 = vrot.slane %v1329_v22, 4  ;;  %v1354_v37 = vrot.slane %v1317_v19, 4 }
 0x276   : > { %v1370_v59 = vrot.slane %v1353_v31, 4  ;;  %v1331_v38 = vsel %vm822_vm6, %v1330_v33, %v1281_v2  ;;  %v1333_v17 = vsel %vm822_vm6, %v1293_v4, %v1332_v34  ;;  %v1356_v39 = vrot.slane %v1305_v24, 4 }
 0x277   : > { %v1369_v40 = vsel %vm822_vm6, %v1349_v36, %v1368_v56  ;;  %v1373_v41 = vsel %vm822_vm6, %v1353_v31, %v1372_v32  ;;  %v1366_v42 = vrot.slane %v1349_v36, 4  ;;  %v1337_v23 = vperm.slane %v1331_v38, %v3761_v51 }
 0x278   : > { %v1503_v43 = vpack.c.bf16 %v1369_v40, %v1369_v40  ;;  %v1505_v44 = vpack.c.bf16 %v1373_v41, %v1373_v41  ;;  %v1371_v45 = vsel %vm822_vm6, %v1370_v59, %v1329_v22  ;;  %v1355_v47 = vsel %vm822_vm6, %v1354_v37, %v1305_v24 }
 0x279   : > { %v1367_v48 = vsel %vm822_vm6, %v1366_v42, %v1325_v25  ;;  %v1504_v49 = vpack.c.bf16 %v1371_v45, %v1371_v45  ;;  %v1361_v52 = vperm.slane %v1355_v47, %v3761_v51  ;;  %v1376_v53 = vrot.slane %v1337_v23, 4 }
 0x27a   : > { %v1534_v54 = vsel %vm1510_vm7, %v1503_v43, 0  ;;  %v1572_v55 = vsel %vm1510_vm7, %v1505_v44, 0  ;;  %v1502_v57 = vpack.c.bf16 %v1367_v48, %v1367_v48  ;;  %v1341_v60 = vperm.slane %v1333_v17, %v3761_v51 }
 0x27b   : > { %1543 = vmatpush.bf16.xpose.msra.mxu1 %v1534_v54  ;;  %1581 = vmatpush.bf16.xpose.msrb.mxu3 %v1572_v55  ;;  %v1553_v62 = vsel %vm1510_vm7, %v1504_v49, 0  ;;  %v1377_v1 = vsel %vm822_vm6, %v1361_v52, %v1376_v53  ;;  %v1357_v2 = vsel %vm822_vm6, %v1317_v19, %v1356_v39  ;;  %v1374_v3 = vrot.slane %v1361_v52, 4 }
 0x27c   : > { %v1515_v4 = vsel %vm1510_vm7, %v1502_v57, 0  ;;  %1562 = vmatpush.bf16.xpose.msra.mxu2 %v1553_v62  ;;  %v1507_v5 = vpack.c.bf16 %v1377_v1, %v1377_v1  ;;  %v1365_v8 = vperm.slane %v1357_v2, %v3761_v51  ;;  %v1380_v13 = vrot.slane %v1341_v60, 4 }
 0x27d   : > { %1524 = vmatpush.bf16.xpose.msrb.mxu0 %v1515_v4  ;;  %v1375_v15 = vsel %vm822_vm6, %v1374_v3, %v1337_v23  ;;  %v1495_v31 = vpack.c.bf16 %v3828_v46, %v3828_v46  ;;  %v1497_v36 = vpack.c.bf16 %v3825_v50, %v3825_v50  ;;  %v1496_v56 = vpack.c.bf16 %v3835_v63, %v3835_v63 }
 0x27e   : > { %v1610_v18 = vsel %vm1510_vm7, %v1507_v5, 0  ;;  %v1381_v24 = vsel %vm822_vm6, %v1365_v8, %v1380_v13  ;;  %v1506_v25 = vpack.c.bf16 %v1375_v15, %v1375_v15  ;;  %v1378_v22 = vrot.slane %v1365_v8, 4 }
 0x27f   : > { %v1509_v26 = vpack.c.bf16 %v1381_v24, %v1381_v24  ;;  %v1494_v32 = vpack.c.bf16 %v3832_v61, %v3832_v61  ;;  %v1499_v50 = vpack.c.bf16 %v3838_v0, %v3838_v0  ;;  %v1501_v46 = vpack.c.bf16 %v3846_v7, %v3846_v7 }
 0x280   : > { %v1591_v19 = vsel %vm1510_vm7, %v1506_v25, 0  ;;  %v1379_v29 = vsel %vm822_vm6, %v1378_v22, %v1341_v60  ;;  %v1500_v63 = vpack.c.bf16 %v3849_v16, %v3849_v16  ;;  %v1498_v61 = vpack.c.bf16 %v3843_v6, %v3843_v6 }
 0x281   : > { %v1648_v33 = vsel %vm1510_vm7, %v1509_v26, 0  ;;  %v1508_v34 = vpack.c.bf16 %v1379_v29, %v1379_v29 }
 0x282   : > { %2945 = vmatmul.msk.bf16.vlgmr.msra.gmra.mxu1 %vm1510_vm7, %v1495_v31  ;;  %2947 = vmatmul.msk.bf16.vlgmr.msrb.gmra.mxu3 %vm1510_vm7, %v1497_v36 }
 0x283   : > { %1619 = vmatpush.bf16.xpose.msrb.mxu1 %v1610_v18  ;;  %1657 = vmatpush.bf16.xpose.msra.mxu3 %v1648_v33  ;;  %v1629_v37 = vsel %vm1510_vm7, %v1508_v34, 0 }
 0x284   : > { %2946 = vmatmul.msk.bf16.vlgmr.msra.gmra.mxu2 %vm1510_vm7, %v1496_v56  ;;  %2944 = vmatmul.msk.bf16.vlgmr.msrb.gmra.mxu0 %vm1510_vm7, %v1494_v32  ;;  %v1053_v32 = vperm.slane %v3722_v11, %v3754_v35 }
 0x285   : > { %1600 = vmatpush.bf16.xpose.msra.mxu0 %v1591_v19  ;;  %1638 = vmatpush.bf16.xpose.msrb.mxu2 %v1629_v37  ;;  %v1057_v37 = vperm.slane %v3727_v14, %v3754_v35 }
 0x287   : > { %v1108_v14 = vrot.slane %v1057_v37, 4 }
 0x292   : > { %2949 = vmatmul.msk.bf16.vlgmr.msrb.gmra.mxu1 %vm1510_vm7, %v1499_v50  ;;  %2951 = vmatmul.msk.bf16.vlgmr.msra.gmra.mxu3 %vm1510_vm7, %v1501_v46  ;;  %v1077_v50 = vperm.slane %v3745_v28, %v3754_v35 }
 0x294   : > { %2950 = vmatmul.msk.bf16.vlgmr.msrb.gmra.mxu2 %vm1510_vm7, %v1500_v63  ;;  %2948 = vmatmul.msk.bf16.vlgmr.msra.gmra.mxu0 %vm1510_vm7, %v1498_v61  ;;  %v1081_v63 = vperm.slane %v3752_v12, %v3754_v35 }
 0x296   : > { %v1132_v12 = vrot.slane %v1081_v63, 4 }
 0x2ff   : > { %v1545_v59 = vpop.f32.mrf.mxu1 }
 0x300   : > { %v1667_v0 = vsel %vm1663_vm8, %v1545_v59, -inf }
 0x301   : > { %1668 = vmax.xlane.f32.xlu2 %v1667_v0  ;;  %v1526_v7 = vpop.f32.mrf.mxu0 }
 0x302   : > { %v1664_v38 = vsel %vm1663_vm8, %v1526_v7, -inf }
 0x303   : > { %1665 = vmax.xlane.f32.xlu0 %v1664_v38 }
 0x305   : > { %v1583_v16 = vpop.f32.mrf.mxu3 }
 0x306   : > { %v1673_v41 = vsel %vm1663_vm8, %v1583_v16, -inf }
 0x307   : > { %v1564_v17 = vpop.f32.mrf.mxu2  ;;  %v1547_v39 = vpop.f32.mrf.mxu1 }
 0x308   : > { %v1670_v6 = vsel %vm1663_vm8, %v1564_v17, -inf  ;;  %v1120_v39 = vrot.slane %v1077_v50, 4 }
 0x309   : > { %1671 = vmax.xlane.f32.xlu1 %v1670_v6  ;;  %v1528_v40 = vpop.f32.mrf.mxu0 }
 0x30b   : > { %1674 = vmax.xlane.f32.xlu0 %v1673_v41 }
 0x30d   : > { %v1585_v42 = vpop.f32.mrf.mxu3 }
 0x30f   : > { %v1566_v23 = vpop.f32.mrf.mxu2  ;;  %v1621_v43 = vpop.f32.mrf.mxu1 }
 0x310   : > { %v1679_v45 = vsel %vm1663_vm8, %v1621_v43, -inf }
 0x311   : > { %v3967_v44 = vpop.f32.mrf.mxu0 }
 0x312   : > { %v1676_v60 = vsel %vm1663_vm8, %v3967_v44, -inf }
 0x313   : > { %1680 = vmax.xlane.f32.xlu0 %v1679_v45 }
 0x315   : > { %v1659_v47 = vpop.f32.mrf.mxu3 }
 0x316   : > { %v1685_v53 = vsel %vm1663_vm8, %v1659_v47, -inf }
 0x317   : > { %v3970_v48 = vpop.f32.mrf.mxu2  ;;  %v1623_v49 = vpop.f32.mrf.mxu1 }
 0x318   : > { %v1682_v57 = vsel %vm1663_vm8, %v3970_v48, -inf }
 0x319   : > { %3300 = vrot.lane.b32.xlu2 %v3299_v21, %s3461_s8  ;;  %v1604_v52 = vpop.f32.mrf.mxu0 }
 0x31b   : > { %1686 = vmax.xlane.f32.xlu0 %v1685_v53 }
 0x31d   : > { %v1661_v54 = vpop.f32.mrf.mxu3 }
 0x31f   : > { %v1642_v55 = vpop.f32.mrf.mxu2 }
 0x322   : > { %3305 = vrot.lane.b32.xlu1 %v3304_v30, %s3461_s8 }
 0x323   : > { %1683 = vmax.xlane.f32.xlu0 %v1682_v57 }
 0x32b   : > { %1677 = vmax.xlane.f32.xlu0 %v1676_v60 }
 0x374   : > { %v1669_v58 = vpop.xlane.xlu2 %1668 }
 0x375   : > { %v1689_v20 = vsub.f32 %v1545_v59, %v1669_v58 }
 0x376   : > { %v1666_v21 = vpop.xlane.xlu0 %1665 }
 0x377   : > { %v1698_v62 = vmul.f32 1.442695, %v1689_v20  ;;  %v1688_v1 = vsub.f32 %v1526_v7, %v1666_v21 }
 0x379   : > { %3324 = vpow2.f32 %v1698_v62  ;;  %v1696_v2 = vmul.f32 1.442695, %v1688_v1 }
 0x37b   : > { %3326 = vpow2.f32 %v1696_v2 }
 0x37c   : > { %v1672_v3 = vpop.xlane.xlu1 %1671  ;;  %v3301_v29 = vpop.permute.xlu2 %3300 }
 0x37d   : > { %v1690_v8 = vsub.f32 %v1564_v17, %v1672_v3  ;;  %v3303_v34 = vunpack.i.h.bf16 %v3301_v29  ;;  %v3302_v36 = vunpack.i.l.bf16 %v3301_v29  ;;  %v1096_v17 = vrot.slane %v1053_v32, 4 }
 0x37e   : > { %v1675_v4 = vpop.xlane.xlu0 %1674 }
 0x37f   : > { %v3985_v10 = vpop.eup %3324  ;;  %v1691_v27 = vsub.f32 %v1583_v16, %v1675_v4  ;;  %v1700_v18 = vmul.f32 1.442695, %v1690_v8  ;;  %v1058_v61 = vrot.slane %v3303_v34, 4  ;;  %v1082_v0 = vrot.slane %v3302_v36, 4 }
 0x380   : > { %v1715_v30 = vsel %vm1663_vm8, %v3985_v10, 0.0 }
 0x381   : > { %v3989_v5 = vpop.eup %3326  ;;  %v1702_v13 = vmul.f32 1.442695, %v1691_v27  ;;  %1716 = vadd.xlane.f32.xlu0 %v1715_v30 }
 0x382   : > { %v1712_v15 = vsel %vm1663_vm8, %v3989_v5, 0.0 }
 0x383   : > { %3328 = vpow2.f32 %v1702_v13  ;;  %1713 = vadd.xlane.f32.xlu2 %v1712_v15 }
 0x384   : > { %3330 = vpow2.f32 %v1700_v18 }
 0x386   : > { %v1681_v24 = vpop.xlane.xlu0 %1680 }
 0x387   : > { %v1693_v25 = vsub.f32 %v1621_v43, %v1681_v24 }
 0x389   : > { %v3993_v22 = vpop.eup %3328  ;;  %v1706_v19 = vmul.f32 1.442695, %v1693_v25 }
 0x38a   : > { %v1721_v26 = vsel %vm1663_vm8, %v3993_v22, 0.0  ;;  %v3997_v33 = vpop.eup %3330 }
 0x38b   : > { %1722 = vadd.xlane.f32.xlu0 %v1721_v26  ;;  %3332 = vpow2.f32 %v1706_v19  ;;  %v1718_v46 = vsel %vm1663_vm8, %v3997_v33, 0.0 }
 0x38e   : > { %v1687_v31 = vpop.xlane.xlu0 %1686 }
 0x38f   : > { %v1695_v56 = vsub.f32 %v1659_v47, %v1687_v31 }
 0x391   : > { %v1710_v7 = vmul.f32 1.442695, %v1695_v56  ;;  %v4009_v11 = vpop.eup %3332 }
 0x392   : > { %v1727_v52 = vsel %vm1663_vm8, %v4009_v11, 0.0 }
 0x393   : > { %1719 = vadd.xlane.f32.xlu0 %v1718_v46  ;;  %3334 = vpow2.f32 %v1710_v7 }
 0x394   : > { %v3306_v59 = vpop.permute.xlu1 %3305 }
 0x395   : > { %v3308_v38 = vunpack.i.h.bf16 %v3306_v59  ;;  %v3307_v16 = vunpack.i.l.bf16 %v3306_v59 }
 0x396   : > { %v1684_v42 = vpop.xlane.xlu0 %1683 }
 0x397   : > { %v1059_v28 = vsel %vm822_vm6, %v1058_v61, %v3308_v38  ;;  %v1060_v6 = vrot.slane %v3308_v38, 4  ;;  %v1083_v40 = vsel %vm822_vm6, %v1082_v0, %v3307_v16  ;;  %v1084_v41 = vrot.slane %v3307_v16, 4 }
 0x398   : > { %v1065_v23 = vperm.slane %v1059_v28, %v3754_v35  ;;  %v1089_v43 = vperm.slane %v1083_v40, %v3754_v35  ;;  %v1694_v45 = vsub.f32 %v3970_v48, %v1684_v42 }
 0x399   : > { %v1061_v47 = vsel %vm822_vm6, %v3303_v34, %v1060_v6  ;;  %v1085_v49 = vsel %vm822_vm6, %v3302_v36, %v1084_v41  ;;  %v4034_v24 = vpop.eup %3334 }
 0x39a   : > { %v1069_v53 = vperm.slane %v1061_v47, %v3754_v35  ;;  %v1094_v54 = vrot.slane %v1065_v23, 4  ;;  %v1093_v55 = vperm.slane %v1085_v49, %v3754_v35  ;;  %v1097_v57 = vsel %vm822_vm6, %v1065_v23, %v1096_v17 }
 0x39b   : > { %v1105_v60 = vperm.slane %v1097_v57, %v3761_v51  ;;  %v1118_v58 = vrot.slane %v1089_v43, 4  ;;  %v1121_v48 = vsel %vm822_vm6, %v1089_v43, %v1120_v39  ;;  %v1708_v20 = vmul.f32 1.442695, %v1694_v45  ;;  %1728 = vadd.xlane.f32.xlu0 %v1727_v52 }
 0x39c   : > { %v1106_v21 = vrot.slane %v1069_v53, 4  ;;  %v1095_v62 = vsel %vm822_vm6, %v1094_v54, %v1053_v32  ;;  %v1109_v1 = vsel %vm822_vm6, %v1069_v53, %v1108_v14  ;;  %v1129_v2 = vperm.slane %v1121_v48, %v3761_v51 }
 0x39d   : > { %v1101_v3 = vperm.slane %v1095_v62, %v3761_v51  ;;  %v1117_v4 = vperm.slane %v1109_v1, %v3761_v51  ;;  %v1119_v27 = vsel %vm822_vm6, %v1118_v58, %v1077_v50  ;;  %v1130_v30 = vrot.slane %v1093_v55, 4 }
 0x39e   : > { %v1107_v8 = vsel %vm822_vm6, %v1106_v21, %v1057_v37  ;;  %v1125_v13 = vperm.slane %v1119_v27, %v3761_v51  ;;  %v1133_v15 = vsel %vm822_vm6, %v1093_v55, %v1132_v12  ;;  %v1146_v18 = vrot.slane %v1129_v2, 4  ;;  %v1678_v7 = vpop.xlane.xlu0 %1677 }
 0x39f   : > { %v1113_v25 = vperm.slane %v1107_v8, %v3761_v51  ;;  %v1131_v26 = vsel %vm822_vm6, %v1130_v30, %v1081_v63  ;;  %v1141_v19 = vperm.slane %v1133_v15, %v3761_v51  ;;  %v1144_v29 = vrot.slane %v1101_v3, 4 }
 0x3a0   : > { %v1137_v31 = vperm.slane %v1131_v26, %v3761_v51  ;;  %v1142_v34 = vrot.slane %v1125_v13, 4  ;;  %v1147_v36 = vsel %vm822_vm6, %v1146_v18, %v1105_v60  ;;  %v1148_v56 = vrot.slane %v1105_v60, 4 }
 0x3a1   : > { %v1145_v32 = vsel %vm822_vm6, %v1125_v13, %v1144_v29  ;;  %v1152_v37 = vrot.slane %v1113_v25, 4  ;;  %v1154_v50 = vrot.slane %v1141_v19, 4  ;;  %v1156_v46 = vrot.slane %v1117_v4, 4 }
 0x3a2   : > { %v1143_v61 = vsel %vm822_vm6, %v1142_v34, %v1101_v3  ;;  %v1149_v59 = vsel %vm822_vm6, %v1129_v2, %v1148_v56  ;;  %v1150_v0 = vrot.slane %v1137_v31, 4  ;;  %v1382_v63 = vrot.slane %v1147_v36, 4 }
 0x3a3   : > { %v1155_v38 = vsel %vm822_vm6, %v1154_v50, %v1117_v4  ;;  %v1157_v16 = vsel %vm822_vm6, %v1141_v19, %v1156_v46  ;;  %v1384_v17 = vrot.slane %v1143_v61, 4  ;;  %v1394_v14 = vrot.slane %v1149_v59, 4 }
 0x3a4   : > { %v1396_v39 = vrot.slane %v1145_v32, 4  ;;  %v1406_v28 = vrot.slane %v1155_v38, 4  ;;  %v1418_v6 = vrot.slane %v1157_v16, 4  ;;  %3336 = vpow2.f32 %v1708_v20 }
 0x3a5   : > { %v1733_v40 = vsel %vm1663_vm8, %v4034_v24, 0.0  ;;  %v1692_v41 = vsub.f32 %v3967_v44, %v1678_v7  ;;  %v1151_v42 = vsel %vm822_vm6, %v1150_v0, %v1113_v25  ;;  %v1153_v12 = vsel %vm822_vm6, %v1137_v31, %v1152_v37 }
 0x3a6   : > { %v1397_v23 = vsel %vm822_vm6, %v1149_v59, %v1396_v39  ;;  %1734 = vadd.xlane.f32.xlu1 %v1733_v40  ;;  %v1383_v43 = vsel %vm822_vm6, %v1382_v63, %v1143_v61  ;;  %v1395_v45 = vsel %vm822_vm6, %v1394_v14, %v1145_v32  ;;  %v1407_v47 = vsel %vm822_vm6, %v1406_v28, %v1151_v42 }
 0x3a7   : > { %v1704_v49 = vmul.f32 1.442695, %v1692_v41  ;;  %v1389_v52 = vperm.slane %v1383_v43, %v3754_v35  ;;  %v1401_v53 = vperm.slane %v1395_v45, %v3754_v35  ;;  %v1408_v54 = vrot.slane %v1151_v42, 4 }
 0x3a8   : > { %v1413_v44 = vperm.slane %v1407_v47, %v3754_v35  ;;  %v1419_v55 = vsel %vm822_vm6, %v1418_v6, %v1153_v12  ;;  %v1420_v57 = vrot.slane %v1153_v12, 4  ;;  %v1385_v60 = vsel %vm822_vm6, %v1147_v36, %v1384_v17 }
 0x3a9   : > { %3338 = vpow2.f32 %v1704_v49  ;;  %v1425_v58 = vperm.slane %v1419_v55, %v3754_v35  ;;  %v1430_v48 = vrot.slane %v1401_v53, 4  ;;  %v1432_v20 = vrot.slane %v1389_v52, 4 }
 0x3aa   : > { %v4061_v21 = vpop.eup %3336  ;;  %v1456_v62 = vrot.slane %v1413_v44, 4  ;;  %v1393_v1 = vperm.slane %v1385_v60, %v3754_v35  ;;  %v1405_v2 = vperm.slane %v1397_v23, %v3754_v35  ;;  %v1409_v3 = vsel %vm822_vm6, %v1155_v38, %v1408_v54 }
 0x3ab   : > { %v1730_v4 = vsel %vm1663_vm8, %v4061_v21, 0.0  ;;  %v1431_v27 = vsel %vm822_vm6, %v1430_v48, %v1389_v52  ;;  %v1454_v30 = vrot.slane %v1425_v58, 4  ;;  %v1433_v8 = vsel %vm822_vm6, %v1401_v53, %v1432_v20 }
 0x3ac   : > { %1731 = vadd.xlane.f32.xlu0 %v1730_v4  ;;  %v1437_v13 = vperm.slane %v1431_v27, %v3761_v51  ;;  %v1441_v15 = vperm.slane %v1433_v8, %v3761_v51  ;;  %v1457_v18 = vsel %vm822_vm6, %v1425_v58, %v1456_v62  ;;  %v1417_v25 = vperm.slane %v1409_v3, %v3754_v35 }
 0x3ad   : > { %v1455_v26 = vsel %vm822_vm6, %v1454_v30, %v1413_v44  ;;  %v1465_v19 = vperm.slane %v1457_v18, %v3761_v51  ;;  %v1421_v29 = vsel %vm822_vm6, %v1157_v16, %v1420_v57  ;;  %v1442_v31 = vrot.slane %v1405_v2, 4 }
 0x3ae   : > { %v1461_v34 = vperm.slane %v1455_v26, %v3761_v51  ;;  %v1480_v36 = vrot.slane %v1437_v13, 4  ;;  %v1484_v56 = vrot.slane %v1441_v15, 4  ;;  %v1429_v32 = vperm.slane %v1421_v29, %v3754_v35 }
 0x3af   : > { %v4079_v37 = vpop.eup %3338  ;;  %v1482_v50 = vrot.slane %v1465_v19, 4  ;;  %v1443_v46 = vsel %vm822_vm6, %v1442_v31, %v1393_v1  ;;  %v1444_v61 = vrot.slane %v1393_v1, 4  ;;  %v1468_v59 = vrot.slane %v1417_v25, 4 }
 0x3b0   : > { %v1724_v0 = vsel %vm1663_vm8, %v4079_v37, 0.0  ;;  %v1481_v63 = vsel %vm822_vm6, %v1461_v34, %v1480_v36  ;;  %v1485_v7 = vsel %vm822_vm6, %v1465_v19, %v1484_v56  ;;  %v1478_v38 = vrot.slane %v1461_v34, 4 }
 0x3b1   : > { %v1761_v16 = vpack.c.bf16 %v1481_v63, %v1481_v63  ;;  %v1763_v17 = vpack.c.bf16 %v1485_v7, %v1485_v7  ;;  %v1483_v14 = vsel %vm822_vm6, %v1482_v50, %v1441_v15  ;;  %v1449_v39 = vperm.slane %v1443_v46, %v3761_v51 }
 0x3b2   : > { %v1479_v28 = vsel %vm822_vm6, %v1478_v38, %v1437_v13  ;;  %v1762_v6 = vpack.c.bf16 %v1483_v14, %v1483_v14  ;;  %v1466_v40 = vrot.slane %v1429_v32, 4  ;;  %v1445_v41 = vsel %vm822_vm6, %v1405_v2, %v1444_v61 }
 0x3b3   : > { %v1792_v42 = vsel %vm1771_vm9, %v1761_v16, 0  ;;  %v1830_v12 = vsel %vm1771_vm9, %v1763_v17, 0  ;;  %v1760_v23 = vpack.c.bf16 %v1479_v28, %v1479_v28  ;;  %v1488_v43 = vrot.slane %v1449_v39, 4 }
 0x3b4   : > { %1725 = vadd.xlane.f32.xlu0 %v1724_v0  ;;  %1801 = vmatpush.bf16.msra.mxu1 %v1792_v42  ;;  %v1811_v45 = vsel %vm1771_vm9, %v1762_v6, 0  ;;  %v1467_v47 = vsel %vm822_vm6, %v1466_v40, %v1417_v25  ;;  %v1453_v49 = vperm.slane %v1445_v41, %v3761_v51  ;;  %v1469_v52 = vsel %vm822_vm6, %v1429_v32, %v1468_v59 }
 0x3b5   : > { %1839 = vmatpush.bf16.msrb.mxu3 %v1830_v12  ;;  %v1773_v53 = vsel %vm1771_vm9, %v1760_v23, 0  ;;  %1820 = vmatpush.bf16.msra.mxu2 %v1811_v45  ;;  %v1473_v54 = vperm.slane %v1467_v47, %v3761_v51  ;;  %v1477_v44 = vperm.slane %v1469_v52, %v3761_v51 }
 0x3b6   : > { %1782 = vmatpush.bf16.msrb.mxu0 %v1773_v53  ;;  %v1492_v55 = vrot.slane %v1453_v49, 4 }
 0x3b7   : > { %v1489_v57 = vsel %vm822_vm6, %v1473_v54, %v1488_v43  ;;  %v1486_v60 = vrot.slane %v1473_v54, 4  ;;  %v1490_v58 = vrot.slane %v1477_v44, 4 }
 0x3b8   : > { %v1765_v48 = vpack.c.bf16 %v1489_v57, %v1489_v57  ;;  %v1493_v20 = vsel %vm822_vm6, %v1477_v44, %v1492_v55 }
 0x3b9   : > { %v1767_v62 = vpack.c.bf16 %v1493_v20, %v1493_v20  ;;  %v1487_v1 = vsel %vm822_vm6, %v1486_v60, %v1449_v39  ;;  %v1491_v2 = vsel %vm822_vm6, %v1490_v58, %v1453_v49 }
 0x3ba   : > { %v1868_v3 = vsel %vm1771_vm9, %v1765_v48, 0  ;;  %v1764_v4 = vpack.c.bf16 %v1487_v1, %v1487_v1  ;;  %v1766_v27 = vpack.c.bf16 %v1491_v2, %v1491_v2 }
 0x3bb   : > { %1877 = vmatpush.bf16.msrb.mxu1 %v1868_v3  ;;  %v1906_v30 = vsel %vm1771_vm9, %v1767_v62, 0 }
 0x3bc   : > { %1915 = vmatpush.bf16.msra.mxu3 %v1906_v30  ;;  %v1849_v8 = vsel %vm1771_vm9, %v1764_v4, 0  ;;  %v1887_v13 = vsel %vm1771_vm9, %v1766_v27, 0 }
 0x3bd   : > { %1858 = vmatpush.bf16.msra.mxu0 %v1849_v8  ;;  %1896 = vmatpush.bf16.msrb.mxu2 %v1887_v13 }
 0x3f4   : > { %v1717_v15 = vpop.xlane.xlu0 %1716 }
 0x3f5   : > { %3340 = vrcp.f32 %v1717_v15 }
 0x3f6   : > { %v1714_v18 = vpop.xlane.xlu2 %1713 }
 0x3f7   : > { %3342 = vrcp.f32 %v1714_v18 }
 0x3fb   : > { %v3341_v25 = vpop.eup %3340 }
 0x3fc   : > { %v1745_v26 = vmul.f32 %v3341_v25, %v3985_v10 }
 0x3fd   : > { %v3343_v19 = vpop.eup %3342 }
 0x3fe   : > { %v1753_v29 = vpack.c.bf16 %v1745_v26, %v1745_v26  ;;  %v1744_v31 = vmul.f32 %v3343_v19, %v3989_v5  ;;  %v1723_v34 = vpop.xlane.xlu0 %1722 }
 0x3ff   : > { %3344 = vrcp.f32 %v1723_v34 }
 0x400   : > { %v1752_v36 = vpack.c.bf16 %v1744_v31, %v1744_v31  ;;  %2953 = vmatmul.msk.bf16.vlgmr.msra.gmra.mxu1 %vm1663_vm8, %v1753_v29  ;;  %v3168_v29 = vld [vmem:[%s3603_s18 + $0x38] sm:$0xff] }
 0x401   : > { %v3176_v31 = vld [vmem:[%s3603_s18 + $0x78] sm:$0xff] }
 0x402   : > { %2952 = vmatmul.msk.bf16.vlgmr.msrb.gmra.mxu0 %vm1663_vm8, %v1752_v36  ;;  %2438 = vmatpush.bf16.msra.mxu1 %v3176_v31  ;;  %v3164_v31 = vld [vmem:[%s3603_s18 + $0x18] sm:$0xff] }
 0x403   : > { %2425 = vmatpush.bf16.msrb.mxu0 %v3168_v29 }
 0x405   : > { %v3345_v56 = vpop.eup %3344 }
 0x406   : > { %v1747_v32 = vmul.f32 %v3345_v56, %v3993_v22  ;;  %v1720_v50 = vpop.xlane.xlu0 %1719 }
 0x407   : > { %3346 = vrcp.f32 %v1720_v50 }
 0x408   : > { %v1755_v46 = vpack.c.bf16 %v1747_v32, %v1747_v32 }
 0x40a   : > { %2955 = vmatmul.msk.bf16.vlgmr.msrb.gmra.mxu3 %vm1663_vm8, %v1755_v46 }
 0x40d   : > { %v3347_v10 = vpop.eup %3346 }
 0x40e   : > { %v1746_v61 = vmul.f32 %v3347_v10, %v3997_v33  ;;  %v1729_v59 = vpop.xlane.xlu0 %1728 }
 0x40f   : > { %3348 = vrcp.f32 %v1729_v59  ;;  %v3175_v59 = vld [vmem:[%s3603_s18 + $0x70] sm:$0xff] }
 0x410   : > { %v1754_v5 = vpack.c.bf16 %v1746_v61, %v1746_v61  ;;  %v3167_v61 = vld [vmem:[%s3603_s18 + $0x30] sm:$0xff]  ;;  %2439 = vmatpush.bf16.msra.mxu1 %v3175_v59 }
 0x411   : > { %2426 = vmatpush.bf16.msrb.mxu0 %v3167_v61 }
 0x412   : > { %2954 = vmatmul.msk.bf16.vlgmr.msra.gmra.mxu2 %vm1663_vm8, %v1754_v5 }
 0x415   : > { %v3349_v0 = vpop.eup %3348 }
 0x416   : > { %v1749_v63 = vmul.f32 %v3349_v0, %v4009_v11 }
 0x418   : > { %v1757_v38 = vpack.c.bf16 %v1749_v63, %v1749_v63 }
 0x419   : > { %v1735_v7 = vpop.xlane.xlu1 %1734 }
 0x41a   : > { %3350 = vrcp.f32 %v1735_v7  ;;  %2957 = vmatmul.msk.bf16.vlgmr.msrb.gmra.mxu1 %vm1663_vm8, %v1757_v38 }
 0x41f   : > { %v1732_v22 = vpop.xlane.xlu0 %1731 }
 0x420   : > { %v3351_v16 = vpop.eup %3350  ;;  %3352 = vrcp.f32 %v1732_v22 }
 0x421   : > { %v1751_v17 = vmul.f32 %v3351_v16, %v4034_v24  ;;  %v3184_v16 = vld [vmem:[%s3603_s18 + $0xb8] sm:$0xff] }
 0x422   : > { %2451 = vmatpush.bf16.msra.mxu2 %v3184_v16 }
 0x423   : > { %v1759_v14 = vpack.c.bf16 %v1751_v17, %v1751_v17  ;;  %v3192_v17 = vld [vmem:[%s3603_s18 + $0xf8] sm:$0xff] }
 0x424   : > { %2464 = vmatpush.bf16.msrb.mxu3 %v3192_v17 }
 0x425   : > { %2959 = vmatmul.msk.bf16.vlgmr.msra.gmra.mxu3 %vm1663_vm8, %v1759_v14 }
 0x426   : > { %v3353_v33 = vpop.eup %3352 }
 0x427   : > { %v1750_v39 = vmul.f32 %v3353_v33, %v4061_v21  ;;  %v1726_v28 = vpop.xlane.xlu0 %1725 }
 0x428   : > { %3354 = vrcp.f32 %v1726_v28 }
 0x429   : > { %v1758_v6 = vpack.c.bf16 %v1750_v39, %v1750_v39 }
 0x42b   : > { %2958 = vmatmul.msk.bf16.vlgmr.msrb.gmra.mxu2 %vm1663_vm8, %v1758_v6 }
 0x42e   : > { %v3355_v11 = vpop.eup %3354 }
 0x42f   : > { %v1748_v40 = vmul.f32 %v3355_v11, %v4079_v37 }
 0x431   : > { %v1756_v41 = vpack.c.bf16 %v1748_v40, %v1748_v40 }
 0x433   : > { %2956 = vmatmul.msk.bf16.vlgmr.msra.gmra.mxu0 %vm1663_vm8, %v1756_v41  ;;  %v3166_v41 = vld [vmem:[%s3603_s18 + $0x28] sm:$0xff] }
 0x434   : > { %2427 = vmatpush.bf16.msrb.mxu0 %v3166_v41 }
 0x47d   : > { %v1803_v42 = vpop.f32.mrf.mxu1 }
 0x47e   : > { %v1935_v57 = vrot.slane %v1803_v42, 4 }
 0x47f   : > { %v1784_v12 = vpop.f32.mrf.mxu0 }
 0x480   : > { %v1923_v44 = vrot.slane %v1784_v12, 4 }
 0x485   : > { %v1805_v24 = vpop.f32.mrf.mxu1 }
 0x487   : > { %v1786_v23 = vpop.f32.mrf.mxu0 }
 0x48d   : > { %v1841_v43 = vpop.f32.mrf.mxu3 }
 0x48e   : > { %v1933_v54 = vrot.slane %v1841_v43, 4  ;;  %v1936_v58 = vsel %vm822_vm6, %v1841_v43, %v1935_v57 }
 0x48f   : > { %v1944_v3 = vperm.slane %v1936_v58, %v3754_v35  ;;  %v3165_v58 = vld [vmem:[%s3603_s18 + $0x20] sm:$0xff] }
 0x490   : > { %v1934_v37 = vsel %vm822_vm6, %v1933_v54, %v1803_v42  ;;  %v3174_v42 = vld [vmem:[%s3603_s18 + $0x68] sm:$0xff]  ;;  %2428 = vmatpush.bf16.msrb.mxu0 %v3165_v58 }
 0x491   : > { %v1940_v20 = vperm.slane %v1934_v37, %v3754_v35  ;;  %v1981_v18 = vrot.slane %v1944_v3, 4  ;;  %2440 = vmatpush.bf16.msra.mxu1 %v3174_v42 }
 0x493   : > { %v1969_v8 = vrot.slane %v1940_v20, 4 }
 0x494   : > { %2429 = vmatpush.bf16.msrb.mxu0 %v3164_v31 }
 0x495   : > { %v1822_v45 = vpop.f32.mrf.mxu2  ;;  %v1843_v47 = vpop.f32.mrf.mxu3 }
 0x496   : > { %v1921_v52 = vrot.slane %v1822_v45, 4  ;;  %v1924_v60 = vsel %vm822_vm6, %v1822_v45, %v1923_v44 }
 0x497   : > { %v1879_v49 = vpop.f32.mrf.mxu1  ;;  %v1932_v62 = vperm.slane %v1924_v60, %v3754_v35 }
 0x498   : > { %v1922_v55 = vsel %vm822_vm6, %v1921_v52, %v1784_v12  ;;  %v1959_v27 = vrot.slane %v1879_v49, 4 }
 0x499   : > { %v1928_v48 = vperm.slane %v1922_v55, %v3754_v35  ;;  %v1983_v13 = vrot.slane %v1932_v62, 4  ;;  %v1982_v56 = vsel %vm822_vm6, %v1981_v18, %v1932_v62 }
 0x49a   : > { %v1988_v14 = vperm.slane %v1982_v56, %v3761_v51 }
 0x49b   : > { %v1971_v4 = vrot.slane %v1928_v48, 4  ;;  %v1970_v25 = vsel %vm822_vm6, %v1969_v8, %v1928_v48  ;;  %v1984_v32 = vsel %vm822_vm6, %v1944_v3, %v1983_v13  ;;  %v3173_v48 = vld [vmem:[%s3603_s18 + $0x60] sm:$0xff] }
 0x49c   : > { %v1976_v5 = vperm.slane %v1970_v25, %v3761_v51  ;;  %v1992_v33 = vperm.slane %v1984_v32, %v3761_v51  ;;  %v2027_v44 = vrot.slane %v1988_v14, 4  ;;  %2441 = vmatpush.bf16.msra.mxu1 %v3173_v48 }
 0x49d   : > { %v1824_v21 = vpop.f32.mrf.mxu2  ;;  %v1972_v34 = vsel %vm822_vm6, %v1940_v20, %v1971_v4 }
 0x49e   : > { %v1980_v7 = vperm.slane %v1972_v34, %v3761_v51  ;;  %v2019_v12 = vrot.slane %v1976_v5, 4  ;;  %v2031_v55 = vrot.slane %v1992_v33, 4  ;;  %v3172_v34 = vld [vmem:[%s3603_s18 + $0x58] sm:$0xff] }
 0x49f   : > { %v1881_v53 = vpop.f32.mrf.mxu1 }
 0x4a0   : > { %v2023_v23 = vrot.slane %v1980_v7, 4  ;;  %2442 = vmatpush.bf16.msra.mxu1 %v3172_v34 }
 0x4a8   : > { %v1917_v1 = vpop.f32.mrf.mxu3 }
 0x4a9   : > { %v1957_v2 = vrot.slane %v1917_v1, 4  ;;  %v1960_v15 = vsel %vm822_vm6, %v1917_v1, %v1959_v27 }
 0x4aa   : > { %v1968_v50 = vperm.slane %v1960_v15, %v3754_v35 }
 0x4ab   : > { %v1958_v30 = vsel %vm822_vm6, %v1957_v2, %v1879_v49 }
 0x4ac   : > { %v1964_v26 = vperm.slane %v1958_v30, %v3754_v35  ;;  %v2005_v28 = vrot.slane %v1968_v50, 4 }
 0x4ae   : > { %v1898_v19 = vpop.f32.mrf.mxu2  ;;  %v1993_v38 = vrot.slane %v1964_v26, 4 }
 0x4af   : > { %v1945_v36 = vrot.slane %v1898_v19, 4 }
 0x4b0   : > { %v1919_v46 = vpop.f32.mrf.mxu3  ;;  %v1860_v10 = vpop.f32.mrf.mxu0 }
 0x4b1   : > { %v1946_v0 = vsel %vm822_vm6, %v1945_v36, %v1860_v10  ;;  %v1947_v63 = vrot.slane %v1860_v10, 4 }
 0x4b2   : > { %v1952_v22 = vperm.slane %v1946_v0, %v3754_v35 }
 0x4b3   : > { %v1948_v39 = vsel %vm822_vm6, %v1898_v19, %v1947_v63 }
 0x4b4   : > { %v1956_v6 = vperm.slane %v1948_v39, %v3754_v35  ;;  %v1994_v11 = vsel %vm822_vm6, %v1993_v38, %v1952_v22  ;;  %v1995_v40 = vrot.slane %v1952_v22, 4 }
 0x4b5   : > { %v2000_v24 = vperm.slane %v1994_v11, %v3761_v51  ;;  %v3171_v11 = vld [vmem:[%s3603_s18 + $0x50] sm:$0xff] }
 0x4b6   : > { %v1996_v43 = vsel %vm822_vm6, %v1964_v26, %v1995_v40  ;;  %v2006_v45 = vsel %vm822_vm6, %v2005_v28, %v1956_v6  ;;  %v2007_v47 = vrot.slane %v1956_v6, 4  ;;  %v1900_v49 = vpop.f32.mrf.mxu2  ;;  %2443 = vmatpush.bf16.msra.mxu1 %v3171_v11 }
 0x4b7   : > { %v2004_v21 = vperm.slane %v1996_v43, %v3761_v51  ;;  %v2012_v52 = vperm.slane %v2006_v45, %v3761_v51  ;;  %v2017_v53 = vrot.slane %v2000_v24, 4  ;;  %v2020_v54 = vsel %vm822_vm6, %v2000_v24, %v2019_v12 }
 0x4b8   : > { %v2008_v57 = vsel %vm822_vm6, %v1968_v50, %v2007_v47  ;;  %v2047_v37 = vrot.slane %v2020_v54, 4  ;;  %v1862_v60 = vpop.f32.mrf.mxu0 }
 0x4b9   : > { %v2016_v20 = vperm.slane %v2008_v57, %v3761_v51  ;;  %v2018_v62 = vsel %vm822_vm6, %v2017_v53, %v1976_v5  ;;  %v2021_v1 = vrot.slane %v2004_v21, 4  ;;  %v2024_v2 = vsel %vm822_vm6, %v2004_v21, %v2023_v23  ;;  %v3162_v53 = vld [vmem:[%s3603_s18 + $0x8] sm:$0xff] }
 0x4ba   : > { %v2025_v3 = vrot.slane %v2012_v52, 4  ;;  %v2028_v4 = vsel %vm822_vm6, %v2012_v52, %v2027_v44  ;;  %v2035_v27 = vrot.slane %v2018_v62, 4  ;;  %v2045_v30 = vrot.slane %v2024_v2, 4 }
 0x4bb   : > { %v2022_v8 = vsel %vm822_vm6, %v2021_v1, %v1980_v7  ;;  %v2029_v13 = vrot.slane %v2016_v20, 4  ;;  %v2048_v15 = vsel %vm822_vm6, %v2024_v2, %v2047_v37  ;;  %v2071_v18 = vrot.slane %v2028_v4, 4  ;;  %v3170_v37 = vld [vmem:[%s3603_s18 + $0x48] sm:$0xff] }
 0x4bc   : > { %v2026_v25 = vsel %vm822_vm6, %v2025_v3, %v1988_v14  ;;  %v2033_v26 = vrot.slane %v2022_v8, 4  ;;  %v2046_v19 = vsel %vm822_vm6, %v2045_v30, %v2020_v54  ;;  %v2032_v29 = vsel %vm822_vm6, %v2016_v20, %v2031_v55  ;;  %v3163_v14 = vld [vmem:[%s3603_s18 + $0x10] sm:$0xff]  ;;  %2444 = vmatpush.bf16.msra.mxu1 %v3170_v37 }
 0x4bd   : > { %v2052_v36 = vperm.slane %v2046_v19, %v3754_v35  ;;  %v2059_v56 = vrot.slane %v2026_v25, 4  ;;  %v2030_v32 = vsel %vm822_vm6, %v2029_v13, %v1992_v33  ;;  %v2036_v50 = vsel %vm822_vm6, %v2022_v8, %v2035_v27  ;;  %2430 = vmatpush.bf16.msrb.mxu0 %v3163_v14  ;;  %v3185_v14 = vld [vmem:[%s3603_s18 + $0xc0] sm:$0xff] }
 0x4be   : > { %v2034_v46 = vsel %vm822_vm6, %v2033_v26, %v2018_v62  ;;  %v2044_v10 = vperm.slane %v2036_v50, %v3754_v35  ;;  %v2056_v61 = vperm.slane %v2048_v15, %v3754_v35  ;;  %v2057_v59 = vrot.slane %v2030_v32, 4  ;;  %v3161_v50 = vld [vmem:[%s3603_s18] sm:$0xff] }
 0x4bf   : > { %v2060_v5 = vsel %vm822_vm6, %v2030_v32, %v2059_v56  ;;  %v2069_v0 = vrot.slane %v2032_v29, 4  ;;  %v2072_v63 = vsel %vm822_vm6, %v2032_v29, %v2071_v18  ;;  %v2040_v7 = vperm.slane %v2034_v46, %v3754_v35  ;;  %v3183_v56 = vld [vmem:[%s3603_s18 + $0xb0] sm:$0xff]  ;;  %v3169_v46 = vld [vmem:[%s3603_s18 + $0x40] sm:$0xff] }
 0x4c0   : > { %v2068_v38 = vperm.slane %v2060_v5, %v3754_v35  ;;  %v2080_v22 = vperm.slane %v2072_v63, %v3754_v35  ;;  %v2093_v16 = vrot.slane %v2056_v61, 4  ;;  %v2095_v17 = vrot.slane %v2044_v10, 4  ;;  %v3191_v32 = vld [vmem:[%s3603_s18 + $0xf0] sm:$0xff]  ;;  %2452 = vmatpush.bf16.msra.mxu2 %v3183_v56  ;;  %2445 = vmatpush.bf16.msra.mxu1 %v3169_v46  ;;  %v3189_v5 = vld [vmem:[%s3603_s18 + $0xe0] sm:$0xff]  ;;  %v3188_v63 = vld [vmem:[%s3603_s18 + $0xd8] sm:$0xff] }
 0x4c1   : > { %v2058_v33 = vsel %vm822_vm6, %v2057_v59, %v2026_v25  ;;  %v2070_v39 = vsel %vm822_vm6, %v2069_v0, %v2028_v4  ;;  %v2081_v28 = vrot.slane %v2052_v36, 4  ;;  %v2083_v6 = vrot.slane %v2040_v7, 4  ;;  %2431 = vmatpush.bf16.msrb.mxu0 %v3162_v53  ;;  %2465 = vmatpush.bf16.msrb.mxu3 %v3191_v32  ;;  %v3181_v59 = vld [vmem:[%s3603_s18 + $0xa0] sm:$0xff]  ;;  %v3180_v0 = vld [vmem:[%s3603_s18 + $0x98] sm:$0xff] }
 0x4c2   : > { %v2094_v40 = vsel %vm822_vm6, %v2093_v16, %v2044_v10  ;;  %v2096_v41 = vsel %vm822_vm6, %v2056_v61, %v2095_v17  ;;  %v2117_v42 = vrot.slane %v2080_v22, 4  ;;  %v2119_v12 = vrot.slane %v2068_v38, 4  ;;  %v3182_v10 = vld [vmem:[%s3603_s18 + $0xa8] sm:$0xff]  ;;  %v3177_v17 = vld [vmem:[%s3603_s18 + $0x80] sm:$0xff] }
 0x4c3   : > { %v2100_v24 = vperm.slane %v2094_v40, %v3761_v51  ;;  %v2104_v23 = vperm.slane %v2096_v41, %v3761_v51  ;;  %v2064_v43 = vperm.slane %v2058_v33, %v3754_v35  ;;  %v2076_v45 = vperm.slane %v2070_v39, %v3754_v35  ;;  %v3190_v61 = vld [vmem:[%s3603_s18 + $0xe8] sm:$0xff] }
 0x4c4   : > { %v2118_v47 = vsel %vm822_vm6, %v2117_v42, %v2068_v38  ;;  %v2120_v49 = vsel %vm822_vm6, %v2080_v22, %v2119_v12  ;;  %v2082_v21 = vsel %vm822_vm6, %v2081_v28, %v2040_v7  ;;  %v2084_v52 = vsel %vm822_vm6, %v2052_v36, %v2083_v6  ;;  %2453 = vmatpush.bf16.msra.mxu2 %v3182_v10  ;;  %v3179_v7 = vld [vmem:[%s3603_s18 + $0x90] sm:$0xff]  ;;  %v3178_v22 = vld [vmem:[%s3603_s18 + $0x88] sm:$0xff] }
 0x4c5   : > { %v2124_v54 = vperm.slane %v2118_v47, %v3761_v51  ;;  %v2128_v44 = vperm.slane %v2120_v49, %v3761_v51  ;;  %v2139_v55 = vrot.slane %v2100_v24, 4  ;;  %v2143_v57 = vrot.slane %v2104_v23, 4  ;;  %2432 = vmatpush.bf16.msrb.mxu0 %v3161_v50  ;;  %2466 = vmatpush.bf16.msrb.mxu3 %v3190_v61  ;;  %v3187_v38 = vld [vmem:[%s3603_s18 + $0xd0] sm:$0xff]  ;;  %v3186_v16 = vld [vmem:[%s3603_s18 + $0xc8] sm:$0xff] }
 0x4c6   : > { %v2088_v35 = vperm.slane %v2082_v21, %v3761_v51  ;;  %v2092_v60 = vperm.slane %v2084_v52, %v3761_v51  ;;  %v2105_v58 = vrot.slane %v2076_v45, 4  ;;  %v2107_v48 = vrot.slane %v2064_v43, 4 }
 0x4c7   : > { %v2137_v20 = vrot.slane %v2124_v54, 4  ;;  %v2140_v62 = vsel %vm822_vm6, %v2124_v54, %v2139_v55  ;;  %v2141_v1 = vrot.slane %v2128_v44, 4  ;;  %v2144_v2 = vsel %vm822_vm6, %v2128_v44, %v2143_v57 }
 0x4c8   : > { %v3309_v3 = vpack.i.bf16 %v2144_v2, %v2140_v62  ;;  %v2106_v4 = vsel %vm822_vm6, %v2105_v58, %v2064_v43  ;;  %v2108_v27 = vsel %vm822_vm6, %v2076_v45, %v2107_v48  ;;  %v2131_v30 = vrot.slane %v2088_v35, 4  ;;  %2454 = vmatpush.bf16.msra.mxu2 %v3181_v59  ;;  %v3361_v58 = vld [vmem:[#allocation2] sm:$0xff] }
 0x4c9   : > { %v2112_v8 = vperm.slane %v2106_v4, %v3761_v51  ;;  %v2116_v13 = vperm.slane %v2108_v27, %v3761_v51  ;;  %v2135_v15 = vrot.slane %v2092_v60, 4  ;;  %v2142_v18 = vsel %vm822_vm6, %v2141_v1, %v2104_v23  ;;  %2467 = vmatpush.bf16.msrb.mxu3 %v3189_v5 }
 0x4ca   : > { %3310 = vrot.lane.b32.xlu0 %v3309_v3, %s3461_s8  ;;  %v2138_v25 = vsel %vm822_vm6, %v2137_v20, %v2100_v24 }
 0x4cb   : > { %v2129_v26 = vrot.slane %v2112_v8, 4  ;;  %v2132_v19 = vsel %vm822_vm6, %v2112_v8, %v2131_v30  ;;  %v2133_v29 = vrot.slane %v2116_v13, 4  ;;  %v2136_v31 = vsel %vm822_vm6, %v2116_v13, %v2135_v15  ;;  %v3194_v13 = vld [vmem:[%s3608_s24 + $0x8] sm:$0xff]  ;;  %v3193_v15 = vld [vmem:[%s3608_s24] sm:$0xff] }
 0x4cc   : > { %v3314_v34 = vpack.i.bf16 %v2136_v31, %v2132_v19  ;;  %2455 = vmatpush.bf16.msra.mxu2 %v3180_v0  ;;  %2535 = vmatpush.bf16.msra.mxu0 %v3194_v13  ;;  %v3201_v0 = vld [vmem:[%s3614_s0 + $0x30] sm:$0xff] }
 0x4cd   : > { %v2134_v51 = vsel %vm822_vm6, %v2133_v29, %v2092_v60  ;;  %v2130_v36 = vsel %vm822_vm6, %v2129_v26, %v2088_v35  ;;  %2468 = vmatpush.bf16.msrb.mxu3 %v3188_v63  ;;  %v4242_v35 = vld [vmem:[%s3620_s20] sm:$0x3f]  ;;  %v3200_v63 = vld [vmem:[%s3614_s0 + $0x28] sm:$0xff] }
 0x4ce   : > { %3315 = vrot.lane.b32.xlu2 %v3314_v34, %s3461_s8  ;;  %v2478_v60 = vperm.slane %v4242_v35, 2  ;;  %v2502_v32 = vperm.slane %v4242_v35, 3  ;;  %v2504_v10 = vperm.slane %v4242_v35, 4 }
 0x4d0   : > { %2456 = vmatpush.bf16.msra.mxu2 %v3179_v7  ;;  %2536 = vmatpush.bf16.msra.mxu0 %v3193_v15  ;;  %v3199_v7 = vld [vmem:[%s3614_s0 + $0x20] sm:$0xff] }
 0x4d1   : > { %2469 = vmatpush.bf16.msrb.mxu3 %v3187_v38  ;;  %v3198_v38 = vld [vmem:[%s3614_s0 + $0x18] sm:$0xff] }
 0x4d4   : > { %2457 = vmatpush.bf16.msra.mxu2 %v3178_v22  ;;  %v3197_v22 = vld [vmem:[%s3614_s0 + $0x10] sm:$0xff] }
 0x4d5   : > { %2470 = vmatpush.bf16.msrb.mxu3 %v3186_v16  ;;  %v3196_v16 = vld [vmem:[%s3614_s0 + $0x8] sm:$0xff] }
 0x4d8   : > { %2458 = vmatpush.bf16.msra.mxu2 %v3177_v17  ;;  %v3195_v17 = vld [vmem:[%s3614_s0] sm:$0xff] }
 0x4d9   : > { %2471 = vmatpush.bf16.msrb.mxu3 %v3185_v14  ;;  %v3319_v14 = vld [vmem:[%s423_s21] ss:$0 sm:$0xff] }
 0x528   : > { %v3316_v33 = vpop.permute.xlu2 %3315 }
 0x529   : > { %v3318_v39 = vunpack.i.h.bf16 %v3316_v33  ;;  %v3317_v28 = vunpack.i.l.bf16 %v3316_v33 }
 0x52b   : > { %v2162_v6 = vsel %vm1510_vm7, %v2134_v51, %v3318_v39  ;;  %v2161_v11 = vsel %vm1510_vm7, %v2130_v36, %v3317_v28 }
 0x52c   : > { %v2166_v40 = vpack.c.bf16 %v2162_v6, %v2162_v6  ;;  %v2165_v41 = vpack.c.bf16 %v2161_v11, %v2161_v11 }
 0x52e   : > { %2433 = vmatmul.bf16.vlgmr.msrb.gmra.mxu0 %v2165_v41  ;;  %2446 = vmatmul.bf16.vlgmr.msra.gmra.mxu1 %v2166_v40 }
 0x53c   : > { %v3311_v42 = vpop.permute.xlu0 %3310 }
 0x53d   : > { %v3313_v12 = vunpack.i.h.bf16 %v3311_v42  ;;  %v3312_v24 = vunpack.i.l.bf16 %v3311_v42 }
 0x53f   : > { %v2164_v23 = vsel %vm1510_vm7, %v2142_v18, %v3313_v12  ;;  %v2163_v43 = vsel %vm1510_vm7, %v2138_v25, %v3312_v24  ;;  %v3202_v18 = vld [vmem:[%s3614_s0 + $0x38] sm:$0xff] }
 0x540   : > { %v2168_v45 = vpack.c.bf16 %v2164_v23, %v2164_v23  ;;  %v2167_v47 = vpack.c.bf16 %v2163_v43, %v2163_v43  ;;  %2616 = vmatpush.bf16.msrb.mxu1 %v3202_v18 }
 0x542   : > { %2459 = vmatmul.bf16.vlgmr.msra.gmra.mxu2 %v2167_v47  ;;  %2472 = vmatmul.bf16.vlgmr.msrb.gmra.mxu3 %v2168_v45  ;;  %v2630_v47 = vperm.slane %v4242_v35, 5 }
 0x544   : > { %2617 = vmatpush.bf16.msrb.mxu1 %v3201_v0 }
 0x548   : > { %2618 = vmatpush.bf16.msrb.mxu1 %v3200_v63 }
 0x54c   : > { %2619 = vmatpush.bf16.msrb.mxu1 %v3199_v7 }
 0x550   : > { %2620 = vmatpush.bf16.msrb.mxu1 %v3198_v38 }
 0x554   : > { %2621 = vmatpush.bf16.msrb.mxu1 %v3197_v22 }
 0x558   : > { %2622 = vmatpush.bf16.msrb.mxu1 %v3196_v16 }
 0x55c   : > { %2623 = vmatpush.bf16.msrb.mxu1 %v3195_v17 }
 0x5ab   : > { %v2434_v49 = vpop.f32.mrf.mxu0  ;;  %v2447_v21 = vpop.f32.mrf.mxu1 }
 0x5ac   : > { %v2448_v54 = vadd.f32 %v2447_v21, %v2434_v49 }
 0x5b3   : > { %v2436_v52 = vpop.f32.mrf.mxu0  ;;  %v2449_v53 = vpop.f32.mrf.mxu1 }
 0x5c5   : > { %v2460_v44 = vpop.f32.mrf.mxu2  ;;  %v2473_v55 = vpop.f32.mrf.mxu3 }
 0x5c6   : > { %v2461_v57 = vadd.f32 %v2460_v44, %v2448_v54 }
 0x5c8   : > { %v2474_v37 = vadd.f32 %v2473_v55, %v2461_v57 }
 0x5ca   : > { %v2477_v48 = vadd.f32 %v3361_v58, %v2474_v37 }
 0x5cc   : > { %v4245_v20 = vadd.f32 %v2478_v60, %v2477_v48 }
 0x5cd   : > { %v2462_v62 = vpop.f32.mrf.mxu2  ;;  %v2475_v1 = vpop.f32.mrf.mxu3 }
 0x5ce   : > { %v2480_v2 = vsel %vm435_vm1, %v4245_v20, 0.0 }
 0x5cf   : > { %2481 = vadd.xlane.f32.xlu1 %v2480_v2 }
 0x642   : > { %v2482_v3 = vpop.xlane.xlu1 %2481 }
 0x643   : > { %v2483_v4 = vmul.f32 %v2482_v3, %v3629_v9 }
 0x645   : > { %v2484_v27 = vsub.f32 %v4245_v20, %v2483_v4 }
 0x647   : > { %v2485_v30 = vmul.f32 %v2484_v27, %v2484_v27 }
 0x649   : > { %v2486_v8 = vsel %vm435_vm1, %v2485_v30, 0.0 }
 0x64a   : > { %2487 = vadd.xlane.f32.xlu0 %v2486_v8 }
 0x6bd   : > { %v2488_v25 = vpop.xlane.xlu0 %2487 }
 0x6be   : > { %v2489_v26 = vmul.f32 %v2488_v25, %v3629_v9 }
 0x6c0   : > { %v2490_v19 = vadd.f32 1e-05, %v2489_v26 }
 0x6c2   : > { %3356 = vrsqrt.f32 %v2490_v19  ;;  %vm2497_vm11 = vweird.f32 %v2490_v19 }
 0x6c8   : > { %v3357_v29 = vpop.eup %3356 }
 0x6c9   : > { %v2492_v31 = vmul.f32 %v3357_v29, %v2490_v19  ;;  %vm2498_vm10 = vweird.f32 %v3357_v29 }
 0x6ca   : > { %vm2499_vm12 = vmor %vm2497_vm11, %vm2498_vm10 }
 0x6cb   : > { %v2493_v34 = vmul.f32 %v3357_v29, %v2492_v31 }
 0x6cd   : > { %v2494_v51 = vmul.f32 0.5, %v2493_v34 }
 0x6cf   : > { %v2495_v36 = vsub.f32 1.5, %v2494_v51 }
 0x6d1   : > { %v2496_v56 = vmul.f32 %v3357_v29, %v2495_v36 }
 0x6d3   : > { %v2500_v50 = vsel %vm2499_vm12, %v3357_v29, %v2496_v56 }
 0x6d4   : > { %v2501_v46 = vmul.f32 %v2500_v50, %v2484_v27 }
 0x6d6   : > { %v2503_v61 = vmul.f32 %v2502_v32, %v2501_v46 }
 0x6d8   : > { %v2505_v59 = vadd.f32 %v2504_v10, %v2503_v61 }
 0x6da   : > { %v2506_v5 = vpack.c.bf16 %v2505_v59, %v2505_v59 }
 0x6dc   : > { %3096 = vmatmul.msk.bf16.vlgmr.msra.gmra.mxu0 %vm435_vm1, %v2506_v5 }
 0x759   : > { %v2538_v33 = vpop.f32.mrf.mxu0 }
 0x75a   : > { %v2539_v39 = vadd.f32 %v3319_v14, %v2538_v33 }
 0x75c   : > { %v2542_v28 = vmul.f32 %v2539_v39, %v2539_v39 }
 0x75e   : > { %v2543_v6 = vmul.f32 %v2542_v28, %v2539_v39 }
 0x760   : > { %v2544_v11 = vmul.f32 0.044715, %v2543_v6 }
 0x761   : > { %v2540_v40 = vpop.f32.mrf.mxu0 }
 0x762   : > { %v2545_v41 = vadd.f32 %v2544_v11, %v2539_v39 }
 0x764   : > { %v2546_v42 = vmul.f32 0.7978846, %v2545_v41 }
 0x766   : > { %3358 = vtanh.f32 %v2546_v42 }
 0x76c   : > { %v3359_v12 = vpop.eup %3358 }
 0x76d   : > { %v2548_v24 = vadd.f32 1.0, %v3359_v12 }
 0x76f   : > { %v2549_v23 = vmul.f32 0.5, %v2548_v24 }
 0x771   : > { %v2550_v43 = vmul.f32 %v2549_v23, %v2539_v39 }
 0x773   : > { %v2551_v45 = vpack.c.bf16 %v2550_v43, %v2550_v43 }
 0x775   : > { %2624 = vmatmul.bf16.vlgmr.msrb.gmra.mxu1 %v2551_v45 }
 0x7f2   : > { %v2625_v49 = vpop.f32.mrf.mxu1 }
 0x7f3   : > { %v2629_v21 = vadd.f32 %v2625_v49, %v4245_v20 }
 0x7f5   : > { %v2631_v52 = vadd.f32 %v2630_v47, %v2629_v21 }
 0x7f6   : > { %2636 = sbr.rel (%p3129_p1) target bundleno = 2312 (0x908), region = 60 }
 0x7f7   : > { %2632 = vst.msk [vmem:[#allocation2] sm:$0xff] %vm435_vm1, %v2631_v52 }
 0x7fa   : > { %v2627_v53 = vpop.f32.mrf.mxu1 }
 0x7fb   : > { %v2638_v54 = vsel %vm435_vm1, %v2631_v52, 0.0  ;;  %v2637_v3 = vld [vmem:[%s4338_s7] sm:$0x3] }
 0x7fc   : > { %2639 = vadd.xlane.f32.xlu0 %v2638_v54  ;;  %v2660_v30 = vperm.slane %v2637_v3, 0 }
 0x86f   : > { %v2640_v44 = vpop.xlane.xlu0 %2639 }
 0x870   : > { %v2641_v55 = vmul.f32 %v2640_v44, %v3629_v9 }
 0x872   : > { %v2642_v57 = vsub.f32 %v2631_v52, %v2641_v55 }
 0x874   : > { %v2643_v37 = vmul.f32 %v2642_v57, %v2642_v57 }
 0x876   : > { %v2644_v35 = vsel %vm435_vm1, %v2643_v37, 0.0 }
 0x877   : > { %2645 = vadd.xlane.f32.xlu0 %v2644_v35 }
 0x8ea   : > { %v2646_v60 = vpop.xlane.xlu0 %2645 }
 0x8eb   : > { %v2647_v58 = vmul.f32 %v2646_v60, %v3629_v9  ;;  %v2662_v9 = vperm.slane %v2637_v3, 1 }
 0x8ed   : > { %v2648_v48 = vadd.f32 1e-05, %v2647_v58 }
 0x8ef   : > { %3362 = vrsqrt.f32 %v2648_v48  ;;  %vm2655_vm14 = vweird.f32 %v2648_v48 }
 0x8f5   : > { %v3363_v20 = vpop.eup %3362 }
 0x8f6   : > { %v2650_v62 = vmul.f32 %v3363_v20, %v2648_v48  ;;  %vm2656_vm13 = vweird.f32 %v3363_v20 }
 0x8f7   : > { %vm2657_vm15 = vmor %vm2655_vm14, %vm2656_vm13 }
 0x8f8   : > { %v2651_v1 = vmul.f32 %v3363_v20, %v2650_v62 }
 0x8fa   : > { %v2652_v2 = vmul.f32 0.5, %v2651_v1 }
 0x8fc   : > { %v2653_v4 = vsub.f32 1.5, %v2652_v2 }
 0x8fe   : > { %v2654_v27 = vmul.f32 %v3363_v20, %v2653_v4 }
 0x900   : > { %v2658_v8 = vsel %vm2657_vm15, %v3363_v20, %v2654_v27 }
 0x901   : > { %v2659_v13 = vmul.f32 %v2658_v8, %v2642_v57 }
 0x903   : > { %v2661_v15 = vmul.f32 %v2660_v30, %v2659_v13 }
 0x905   : > { %v2663_v18 = vadd.f32 %v2662_v9, %v2661_v15 }
 0x907   : > { %2664 = vst.msk [vmem:[%s392_s1] sm:$0xff] %vm435_vm1, %v2663_v18 }
 0x908 PF: > { %s3131_s12 = sshll.u32 %s3446_s9, 3  ;;  %s4366_s25 = sld [smem:[#allocation17_spill]] }
 0x909   : > { %s2678_s24 = sshll.u32 %s392_s1, 4  ;;  %s4367_s26 = sand.u32 1, %s3434_s28   ;;  %s2679_s24 = int_to_ptr.vmem [resolvable:$true] %s2678_s24 }
 0x90a   : > { %s2666_s14 = scalar_lea.sflag [#allocation4], %s4367_s26 }
 0x90e   : > { %s2676_s19 = scalar_lea.hbm %s4366_s25, %s3131_s12  ;;  %s3384_s29 = scalar_lea.hbm %s4366_s25, 16 }
 0x90f   : > { %s2680_s13 = sshll.u32 %s2676_s19, 4  ;;  %s2681_s13 = int_to_ptr.hbm [resolvable:$true] %s2680_s13 }
 0x910   : > { %s3378_s11 = sshra.s32 %s2681_s13, 4  ;;  %s3379_s11 = int_to_ptr.hbm [resolvable:$true] %s3378_s11 }
 0x911   : > { %s3380_s15 = scalar_lea.hbm %s3379_s11, 8  ;;  %p3385_p6 = scmp.lt.s32.totalorder %s3379_s11, %s4366_s25 }
 0x912   : > { %p3381_p2 = scmp.ne.s32.totalorder %s3379_s11, %s3380_s15  ;;  %p3386_p7 = scmp.lt.s32.totalorder %s3384_s29, %s3380_s15 }
 0x914   : > { %p3382_p4 = pnand %p3381_p2, %p3558_p3  ;;  %p3387_p8 = por %p3386_p7, %p3385_p6 }
 0x916   : > { %p3383_p5 = pneg %p3382_p4 }
 0x918   : > { %p3388_p10 = pnand %p3387_p8, %p3383_p5 }
 0x91a   : > { %3391 = shalt.err (!%p3388_p10)
}
 0x91b   : > { %3204 = dma.vmem_to_hbm [thread:$0]  (%p3558_p3), %s2679_s24, 128, %s2681_s13, %s2666_s14  }
 0x91c PF: > { %s4368_s1 = sld [smem:[#allocation10_spill]] }
 0x91d   : > { %s4369_s23 = sld [smem:[#allocation6_spill]] }
 0x922   : > { %p3210_p11 = scmp.ge.s32.totalorder %s4368_s1, 2 }
 0x923   : > { %s2692_s27 = sand.u32 1, %s4369_s23  }
 0x924   : > { %p3207_p12 = pnand %p3210_p11, %p3568_p9  ;;  %s2693_s10 = scalar_lea.sflag [#allocation4], %s2692_s27 }
 0x926   : > { %p3208_p13 = pneg %p3207_p12 }
 0x928   : > { %3425 = dma.done.wait (%p3208_p13), %s2693_s10, 128  }
 0x929   : > { %3427 = vsyncadd (%p3208_p13), %s2693_s10, 4294967168  ;;  %s21_s12 = sadd.s32 1, %s4368_s1   ;;  %s4371_s0 = sld [smem:[#allocation7_spill]] }
 0x92a   : > { %p18_p0 = scmp.ge.s32.totalorder %s21_s12, 6   ;;  %s4372_s29 = sld [smem:[#allocation14_spill]] }
 0x92b   : > { %s4373_s30 = sld [smem:[#allocation8_spill]]  ;;  %s4377_s27 = smov %s3434_s28 }
 0x92c   : > { %s4374_s9 = sld [smem:[#allocation9_spill]]  ;;  %20 = sbr.rel (!%p18_p0) target bundleno = 9 (0x9), region = 113 }
 0x92d   : > { %s4375_s10 = sld [smem:[#allocation11_spill]] }
 0x92e   : > { %s4376_s11 = sld [smem:[#allocation12_spill]] }
 0x92f   : > { %s4378_s28 = smov %s4371_s0 }
 0x931   :  { %2699 = vsyncpa [#allocation4], 1 }
 0x932   :  { %2701 = vsyncpa [#allocation4 + $0x1], 1 }

</bundles_post_ra>
